<compile_context>
chip_gen: v7x
topology: tpu7x:2x2x1
jax: 0.10.0
libtpu: 0.0.40
codegen_flags: <defaults>
</compile_context>

<pallas_src>
import functools

import jax
import jax.numpy as jnp
from jax.experimental import pallas as pl
from jax.experimental.pallas import tpu as pltpu

HIDDEN = 2048


def _round_up(n, m):
    return ((n + m - 1) // m) * m


def _select_tile(M, tm_max):
    """Balanced row tile: <= tm_max, multiple of 8 (or the full extent for a
    single block), and >= 2 grid steps once M > 256 so v7x megacore is used."""
    n_tiles = max(1, -(-M // tm_max))
    if M > 256 and n_tiles < 2:
        n_tiles = 2
    if n_tiles == 1:
        return M                       # full-extent block is always legal
    return _round_up(-(-M // n_tiles), 8)


def _default_bf16_epilogue():
    """bf16 bias/ReLU epilogue on bf16-native VPUs (v6e/v7x); f32 otherwise."""
    try:
        kind = jax.devices()[0].device_kind.lower()
    except Exception:
        return True
    return not any(t in kind for t in ("v2", "v3", "v4", "v5"))


def _mlp_kernel(x_ref, w1_ref, b1_ref, w2_ref, b2_ref, o_ref, *, bf16_epilogue):
    # x_ref : (tm, n_units)      f32 tile of input rows (cast to bf16 here)
    # w1_ref: (n_units, hidden)  bf16, resident across the grid (single-buffered)
    # b1_ref: (1, hidden)        bf16 (bf16 epilogue) or f32 (f32 epilogue)
    # w2_ref: (hidden, n_units)  bf16, resident across the grid (single-buffered)
    # b2_ref: (1, n_units)       f32
    # o_ref : (tm, n_units)      f32
    x = x_ref[...].astype(jnp.bfloat16)            # in-kernel cast (cheap, VPU)
    h = jnp.dot(x, w1_ref[...], preferred_element_type=jnp.float32)
    if bf16_epilogue:
        # v6e/v7x: bf16-native VPU -> half the VALU / store work between dots.
        hb = h.astype(jnp.bfloat16)
        hb = jnp.maximum(hb + b1_ref[...], 0.0)
    else:
        # v5e & older: no bf16 VALU -> keep bias+ReLU in f32, cast once for MXU.
        hb = jnp.maximum(h + b1_ref[...], 0.0).astype(jnp.bfloat16)
    # dropout (eval mode) == identity
    y = jnp.dot(hb, w2_ref[...], preferred_element_type=jnp.float32)
    o_ref[...] = (y + b2_ref[...]).astype(o_ref.dtype)


@functools.partial(jax.jit, static_argnames=("tm", "bf16_epilogue"))
def mlp_forward(x, w1, b1, w2, b2, *, tm=512, bf16_epilogue=True):
    """x: (M, n_units) float32 -> (M, n_units) float32."""
    M, n_units = x.shape
    hidden = w1.shape[1]

    tm_eff = _select_tile(M, tm)
    grid = (pl.cdiv(M, tm_eff),)      # ragged final block handled by Pallas

    # bf16 operands for the MXU (no-op casts if params were pre-cast).
    w1b = w1.astype(jnp.bfloat16)
    w2b = w2.astype(jnp.bfloat16)
    b1c = b1.reshape(1, hidden).astype(
        jnp.bfloat16 if bf16_epilogue else jnp.float32)
    b2c = b2.reshape(1, n_units).astype(jnp.float32)

    cost = pl.CostEstimate(
        flops=4 * M * n_units * hidden,                    # two matmuls
        transcendentals=0,
        bytes_accessed=(x.size * x.dtype.itemsize          # x in (f32)
                        + M * n_units * 4                  # y out (f32)
                        + w1b.size * 2 + w2b.size * 2      # one pass of weights
                        + b1c.size * b1c.dtype.itemsize + b2c.size * 4),
    )

    kernel = functools.partial(_mlp_kernel, bf16_epilogue=bf16_epilogue)

    out = pl.pallas_call(
        kernel,
        out_shape=jax.ShapeDtypeStruct((M, n_units), x.dtype),
        grid_spec=pltpu.PrefetchScalarGridSpec(
            num_scalar_prefetch=0,
            grid=grid,
            in_specs=[
                pl.BlockSpec((tm_eff, n_units), lambda i: (i, 0)),      # x rows
                pl.BlockSpec((n_units, hidden), lambda i: (0, 0),       # W1
                             pipeline_mode=pl.Buffered(1)),
                pl.BlockSpec((1, hidden), lambda i: (0, 0),             # b1
                             pipeline_mode=pl.Buffered(1)),
                pl.BlockSpec((hidden, n_units), lambda i: (0, 0),       # W2
                             pipeline_mode=pl.Buffered(1)),
                pl.BlockSpec((1, n_units), lambda i: (0, 0),            # b2
                             pipeline_mode=pl.Buffered(1)),
            ],
            out_specs=pl.BlockSpec((tm_eff, n_units), lambda i: (i, 0)),
        ),
        compiler_params=pltpu.CompilerParams(
            dimension_semantics=("parallel",),
            # Safe on every generation (v7x scoped default is 32 MiB of 64 MiB
            # physical; v5e default is only 16 MiB); fits tm=512..1024 with the
            # (tm, hidden) intermediates at n_units=128.
            vmem_limit_bytes=32 * 1024 * 1024,
        ),
        cost_estimate=cost,
    )(x, w1b, b1c, w2b, b2c)

    return out


def mlp_apply(x, w1, b1, w2, b2, *, tm=512, bf16_epilogue=None):
    """Apply the fused MLP along the last axis of an arbitrarily-batched x."""
    if bf16_epilogue is None:
        bf16_epilogue = _default_bf16_epilogue()
    lead = x.shape[:-1]
    n_units = x.shape[-1]
    out2d = mlp_forward(x.reshape(-1, n_units), w1, b1, w2, b2,
                        tm=tm, bf16_epilogue=bf16_epilogue)
    return out2d.reshape(*lead, n_units)


def init_mlp_params(key, n_units, hidden=HIDDEN, dtype=jnp.float32):
    """nn.Linear-style init U[-1/sqrt(fan_in), 1/sqrt(fan_in)]; weights pre-transposed."""
    k1, k2, k3, k4 = jax.random.split(key, 4)
    bound1 = 1.0 / (n_units ** 0.5)
    bound2 = 1.0 / (hidden ** 0.5)
    w1 = jax.random.uniform(k1, (n_units, hidden), dtype, -bound1, bound1)
    b1 = jax.random.uniform(k2, (1, hidden), dtype, -bound1, bound1)
    w2 = jax.random.uniform(k3, (hidden, n_units), dtype, -bound2, bound2)
    b2 = jax.random.uniform(k4, (1, n_units), dtype, -bound2, bound2)
    return w1, b1, w2, b2


def prepare_mlp_params(w1, b1, w2, b2):
    """One-time cast of the weights to the kernel dtype (bf16) so the per-call
    astype in the jitted wrapper is a no-op; biases stay f32 (tiny)."""
    return (jnp.asarray(w1, jnp.bfloat16), jnp.asarray(b1, jnp.float32),
            jnp.asarray(w2, jnp.bfloat16), jnp.asarray(b2, jnp.float32))


def _reference(x2d, w1, b1, w2, b2):
    return jnp.maximum(x2d @ w1 + b1, 0.0) @ w2 + b2


if __name__ == "__main__":
    key = jax.random.PRNGKey(0)
    kx, kp, kx2 = jax.random.split(key, 3)

    batch, seq, n_units = 2, 8, 128
    w1, b1, w2, b2 = init_mlp_params(kp, n_units, HIDDEN)
    w1k, b1k, w2k, b2k = prepare_mlp_params(w1, b1, w2, b2)

    # Case 1: small shape consistent with the module (batch=2, seq=8, n_units=128).
    x = jax.random.normal(kx, (batch, seq, n_units), dtype=jnp.float32)
    out = jax.block_until_ready(mlp_apply(x, w1k, b1k, w2k, b2k))
    ref = _reference(x.reshape(-1, n_units), w1, b1, w2, b2).reshape(x.shape)
    assert out.shape == (batch, seq, n_units)
    # bf16 MXU operands with f32 accumulation -> loosened tolerance vs f32 ref.
    assert jnp.allclose(out, ref, atol=5e-2, rtol=5e-2), "mismatch vs reference (case 1)"

    # Case 2: M=300 rows -> 2 balanced tiles (152 + ragged 148), no padding pass.
    x2 = jax.random.normal(kx2, (3, 100, n_units), dtype=jnp.float32)
    out2 = jax.block_until_ready(mlp_apply(x2, w1k, b1k, w2k, b2k))
    ref2 = _reference(x2.reshape(-1, n_units), w1, b1, w2, b2).reshape(x2.shape)
    assert jnp.allclose(out2, ref2, atol=5e-2, rtol=5e-2), "mismatch vs reference (case 2)"

    print("KERNEL_OK")
</pallas_src>

<mosaic_0001>
module attributes {stable_mosaic.version = 11 : i64} {
  func.func @_mlp_kernel(%arg0: i32, %arg1: memref<16x128xf32, #tpu.memory_space<vmem>>, %arg2: memref<128x2048xbf16, #tpu.memory_space<vmem>>, %arg3: memref<1x2048xbf16, #tpu.memory_space<vmem>>, %arg4: memref<2048x128xbf16, #tpu.memory_space<vmem>>, %arg5: memref<1x128xf32, #tpu.memory_space<vmem>>, %arg6: memref<16x128xf32, #tpu.memory_space<vmem>>) attributes {dimension_semantics = [#tpu.dimension_semantics<parallel>], iteration_bounds = array<i64: 1>, scalar_prefetch = 0 : i64, scratch_operands = 0 : i64, tpu.core_type = #tpu.core_type<tc>, window_params = [{transform_indices = @transform_0, window_bounds = array<i64: 16, 128>}, {pipeline_mode = #tpu.pipeline_mode<synchronous>, transform_indices = @transform_1, window_bounds = array<i64: 128, 2048>}, {pipeline_mode = #tpu.pipeline_mode<synchronous>, transform_indices = @transform_2, window_bounds = array<i64: 1, 2048>}, {pipeline_mode = #tpu.pipeline_mode<synchronous>, transform_indices = @transform_3, window_bounds = array<i64: 2048, 128>}, {pipeline_mode = #tpu.pipeline_mode<synchronous>, transform_indices = @transform_4, window_bounds = array<i64: 1, 128>}, {transform_indices = @transform_5, window_bounds = array<i64: 16, 128>}]} {
    %c0 = arith.constant 0 : index
    %c0_0 = arith.constant 0 : index
    %0 = vector.load %arg1[%c0, %c0_0] : memref<16x128xf32, #tpu.memory_space<vmem>>, vector<16x128xf32>
    %1 = arith.truncf %0 : vector<16x128xf32> to vector<16x128xbf16>
    %c0_1 = arith.constant 0 : index
    %c0_2 = arith.constant 0 : index
    %2 = vector.load %arg2[%c0_1, %c0_2] : memref<128x2048xbf16, #tpu.memory_space<vmem>>, vector<128x2048xbf16>
    %cst = arith.constant dense<0.000000e+00> : vector<16x2048xf32>
    %3 = tpu.matmul %1, %2, %cst {dimension_numbers = #tpu.dot_dimension_numbers<[1], [0], [0], [1], [0, 0, 1, 1], [], []>} : vector<16x128xbf16>, vector<128x2048xbf16>, vector<16x2048xf32> -> vector<16x2048xf32>
    %4 = arith.truncf %3 : vector<16x2048xf32> to vector<16x2048xbf16>
    %c0_3 = arith.constant 0 : index
    %c0_4 = arith.constant 0 : index
    %5 = vector.load %arg3[%c0_3, %c0_4] : memref<1x2048xbf16, #tpu.memory_space<vmem>>, vector<1x2048xbf16>
    %6 = vector.broadcast %5 : vector<1x2048xbf16> to vector<16x2048xbf16>
    %7 = arith.addf %4, %6 : vector<16x2048xbf16>
    %cst_5 = arith.constant 0.000000e+00 : bf16
    %8 = vector.broadcast %cst_5 : bf16 to vector<16x2048xbf16>
    %9 = arith.maximumf %7, %8 : vector<16x2048xbf16>
    %c0_6 = arith.constant 0 : index
    %c0_7 = arith.constant 0 : index
    %10 = vector.load %arg4[%c0_6, %c0_7] : memref<2048x128xbf16, #tpu.memory_space<vmem>>, vector<2048x128xbf16>
    %cst_8 = arith.constant dense<0.000000e+00> : vector<16x128xf32>
    %11 = tpu.matmul %9, %10, %cst_8 {dimension_numbers = #tpu.dot_dimension_numbers<[1], [0], [0], [1], [0, 0, 1, 1], [], []>} : vector<16x2048xbf16>, vector<2048x128xbf16>, vector<16x128xf32> -> vector<16x128xf32>
    %c0_9 = arith.constant 0 : index
    %c0_10 = arith.constant 0 : index
    %12 = vector.load %arg5[%c0_9, %c0_10] : memref<1x128xf32, #tpu.memory_space<vmem>>, vector<1x128xf32>
    %13 = vector.broadcast %12 : vector<1x128xf32> to vector<16x128xf32>
    %14 = arith.addf %11, %13 : vector<16x128xf32>
    %c0_11 = arith.constant 0 : index
    %c0_12 = arith.constant 0 : index
    %15 = vector.load %arg6[%c0_11, %c0_12] : memref<16x128xf32, #tpu.memory_space<vmem>>, vector<16x128xf32>
    tpu.vector_store %arg6[%c0_11, %c0_12], %14 {strides = array<i32>} : memref<16x128xf32, #tpu.memory_space<vmem>>, vector<16x128xf32>,
    return
  }
  func.func @transform_0(%arg0: i32) -> (i32, i32) {
    %c0_i32 = arith.constant 0 : i32
    %c0_i32_0 = arith.constant 0 : i32
    return %arg0, %c0_i32 : i32, i32
  }
  func.func @transform_1(%arg0: i32) -> (i32, i32) {
    %c0_i32 = arith.constant 0 : i32
    %c0_i32_0 = arith.constant 0 : i32
    %c0_i32_1 = arith.constant 0 : i32
    return %c0_i32, %c0_i32_0 : i32, i32
  }
  func.func @transform_2(%arg0: i32) -> (i32, i32) {
    %c0_i32 = arith.constant 0 : i32
    %c0_i32_0 = arith.constant 0 : i32
    %c0_i32_1 = arith.constant 0 : i32
    return %c0_i32, %c0_i32_0 : i32, i32
  }
  func.func @transform_3(%arg0: i32) -> (i32, i32) {
    %c0_i32 = arith.constant 0 : i32
    %c0_i32_0 = arith.constant 0 : i32
    %c0_i32_1 = arith.constant 0 : i32
    return %c0_i32, %c0_i32_0 : i32, i32
  }
  func.func @transform_4(%arg0: i32) -> (i32, i32) {
    %c0_i32 = arith.constant 0 : i32
    %c0_i32_0 = arith.constant 0 : i32
    %c0_i32_1 = arith.constant 0 : i32
    return %c0_i32, %c0_i32_0 : i32, i32
  }
  func.func @transform_5(%arg0: i32) -> (i32, i32) {
    %c0_i32 = arith.constant 0 : i32
    %c0_i32_0 = arith.constant 0 : i32
    return %arg0, %c0_i32 : i32, i32
  }
}

</mosaic_0001>

<bundles_post_ra>
// kernel: mlp_forward.1
= control target key start
LH: loop header
LB: loop body
LE: loop exit
PB: predicated region body
PF: predicated region fallthrough
CT: control target
= control target key end

     0   :  { %10 = vsyncpa [#allocation3], 0  ;;  %s3613_s0 = inlined_call_operand.vmem [shape: f32[16,128], index: 0, kind: input, shape index: {}]   ;;  %s3614_s1 = inlined_call_operand.hbm [shape: bf16[128,2048], index: 1, kind: input, shape index: {}]   ;;  %s3615_s2 = inlined_call_operand.vmem [shape: bf16[1,2048], index: 2, kind: input, shape index: {}]   ;;  %s3616_s3 = inlined_call_operand.hbm [shape: bf16[2048,128], index: 3, kind: input, shape index: {}]   ;;  %s3617_s4 = inlined_call_operand.vmem [shape: f32[1,128], index: 4, kind: input, shape index: {}]   ;;  %s3618_s5 = inlined_call_operand.hbm [shape: f32[16,128], index: 5, kind: output, shape index: {}]  }
   0x1   :  { %11 = vsyncpa [#allocation6], 0 }
   0x2   :  { %12 = vsyncpa [#allocation4], 0  ;;  %s3451_s18 = smov [#allocation2]   ;;  %s3379_s22 = scalar_lea.hbm %s3614_s1, 16384 }
   0x3   :  { %s20_s19 = sshll.u32 %s3451_s18, 4  ;;  %p3380_p0 = scmp.ne.s32.totalorder %s3614_s1, %s3379_s22  ;;  %s21_s19 = int_to_ptr.vmem [resolvable:$true] %s20_s19 }
   0x4   :  { %p3383_p1 = scmp.lt.u32.totalorder %s3379_s22, %s3614_s1 }
   0x6   :  { %p3385_p2 = pnand %p3383_p1, %p3380_p0 }
   0x8   :  { %3388 = shalt.err (!%p3385_p2)
}
   0x9   :  { %s3389_s27 = scalar_lea.vmem %s21_s19, 16384  ;;  %p3394_p4 = scmp.lt.s32.totalorder %s21_s19, %s21_s19 }
   0xa   :  { %p3390_p3 = scmp.ne.s32.totalorder %s21_s19, %s3389_s27  ;;  %p3395_p5 = scmp.lt.s32.totalorder %s3389_s27, %s3389_s27 }
   0xc   :  { %p3396_p6 = por %p3395_p5, %p3394_p4 }
   0xe   :  { %p3397_p7 = pnand %p3396_p6, %p3390_p3 }
  0x10   :  { %3400 = shalt.err (!%p3397_p7)
}
  0x11   :  { %s3452_s28 = smov 1024   ;;  %s3453_s29 = smov 64  }
  0x12   :  { %26 = dma.hbm_to_vmem [thread:$0]  %s3614_s1, 16384, %s21_s19, [#allocation3], %s3452_s28, %s3452_s28, %s3453_s29  }
  0x13   :  { %s3454_s7 = smov [#allocation5]   ;;  %s3401_s11 = scalar_lea.hbm %s3616_s3, 16384 }
  0x14   :  { %s34_s8 = sshll.u32 %s3454_s7, 4  ;;  %p3402_p8 = scmp.ne.s32.totalorder %s3616_s3, %s3401_s11  ;;  %s35_s8 = int_to_ptr.vmem [resolvable:$true] %s34_s8 }
  0x15   :  { %p3405_p9 = scmp.lt.u32.totalorder %s3401_s11, %s3616_s3 }
  0x17   :  { %p3407_p10 = pnand %p3405_p9, %p3402_p8 }
  0x19   :  { %3410 = shalt.err (!%p3407_p10)
}
  0x1a   :  { %s3411_s16 = scalar_lea.vmem %s35_s8, 16384  ;;  %p3416_p12 = scmp.lt.s32.totalorder %s35_s8, %s35_s8 }
  0x1b   :  { %p3412_p11 = scmp.ne.s32.totalorder %s35_s8, %s3411_s16  ;;  %p3417_p13 = scmp.lt.s32.totalorder %s3411_s16, %s3411_s16 }
  0x1d   :  { %p3418_p0 = por %p3417_p13, %p3416_p12 }
  0x1f   :  { %p3419_p1 = pnand %p3418_p0, %p3412_p11 }
  0x21   :  { %3422 = shalt.err (!%p3419_p1)
}
  0x22   :  { %s3455_s1 = smov 4  }
  0x23   :  { %40 = dma.hbm_to_vmem [thread:$0]  %s3616_s3, 16384, %s35_s8, [#allocation6], %s3453_s29, %s3453_s29, %s3455_s1  }
  0x24   :  { %3445 = dma.done.wait [#allocation3], 16384  }
  0x25   :  { %3446 = vsyncadd [#allocation3], 4294950912 }
  0x26   :  { %3447 = dma.done.wait [#allocation6], 16384  }
  0x27   :  { %3448 = vsyncadd [#allocation6], 4294950912  ;;  %v3456_v0 = vmov 0   ;;  %v53_v1 = vld [vmem:[#allocation2] sm:$0xff]  ;;  %v54_v3 = vld [vmem:[#allocation2 + $0x8] sm:$0xff] }
  0x28   :  { %853 = vmatprep.mubr.bf16.mxu0 %v3456_v0  ;;  %896 = vmatprep.mubr.bf16.mxu1 %v3456_v0  ;;  %v61_v2 = vld [vmem:[#allocation2 + $0x40] sm:$0xff]  ;;  %v62_v5 = vld [vmem:[#allocation2 + $0x48] sm:$0xff]  ;;  %v55_v63 = vld [vmem:[#allocation2 + $0x10] sm:$0xff] }
  0x29   :  { %v2807_v4 = vcombine.high %v53_v1, %v61_v2  ;;  %v2806_v6 = vcombine.low %v53_v1, %v61_v2  ;;  %v69_v7 = vld [vmem:[#allocation2 + $0x80] sm:$0xff]  ;;  %v2809_v9 = vcombine.high %v54_v3, %v62_v5  ;;  %v2808_v10 = vcombine.low %v54_v3, %v62_v5  ;;  %v70_v12 = vld [vmem:[#allocation2 + $0x88] sm:$0xff]  ;;  %v63_v1 = vld [vmem:[#allocation2 + $0x50] sm:$0xff] }
  0x2a   :  { %v77_v8 = vld [vmem:[#allocation2 + $0xc0] sm:$0xff]  ;;  %v78_v13 = vld [vmem:[#allocation2 + $0xc8] sm:$0xff]  ;;  %v56_v2 = vld [vmem:[#allocation2 + $0x18] sm:$0xff] }
  0x2b   :  { %v2823_v11 = vcombine.high %v69_v7, %v77_v8  ;;  %v85_v14 = vld [vmem:[#allocation2 + $0x100] sm:$0xff]  ;;  %821 = vmatprep.subr.bf16.mxu0 %v2807_v4  ;;  %v2825_v15 = vcombine.high %v70_v12, %v78_v13  ;;  %v86_v17 = vld [vmem:[#allocation2 + $0x108] sm:$0xff]  ;;  %864 = vmatprep.subr.bf16.mxu1 %v2809_v9  ;;  %v2822_v19 = vcombine.low %v69_v7, %v77_v8  ;;  %v64_v3 = vld [vmem:[#allocation2 + $0x58] sm:$0xff] }
  0x2c   :  { %v93_v16 = vld [vmem:[#allocation2 + $0x140] sm:$0xff]  ;;  %v94_v18 = vld [vmem:[#allocation2 + $0x148] sm:$0xff]  ;;  %822 = vmatpush1.bf16.msra.mxu0 %v2806_v6  ;;  %865 = vmatpush1.bf16.msra.mxu1 %v2808_v10  ;;  %v2824_v20 = vcombine.low %v70_v12, %v78_v13  ;;  %v2811_v8 = vcombine.high %v55_v63, %v63_v1  ;;  %v2813_v9 = vcombine.high %v56_v2, %v64_v3  ;;  %v71_v10 = vld [vmem:[#allocation2 + $0x90] sm:$0xff] }
  0x2d   :  { %823 = vmatprep.subr.bf16.mxu0 %v2823_v11  ;;  %v2839_v21 = vcombine.high %v85_v14, %v93_v16  ;;  %866 = vmatprep.subr.bf16.mxu1 %v2825_v15  ;;  %v2841_v22 = vcombine.high %v86_v17, %v94_v18  ;;  %v101_v23 = vld [vmem:[#allocation2 + $0x180] sm:$0xff]  ;;  %v102_v25 = vld [vmem:[#allocation2 + $0x188] sm:$0xff]  ;;  %v2838_v27 = vcombine.low %v85_v14, %v93_v16  ;;  %v79_v11 = vld [vmem:[#allocation2 + $0xd0] sm:$0xff] }
  0x2e   :  { %v109_v24 = vld [vmem:[#allocation2 + $0x1c0] sm:$0xff]  ;;  %v110_v26 = vld [vmem:[#allocation2 + $0x1c8] sm:$0xff]  ;;  %v2840_v28 = vcombine.low %v86_v17, %v94_v18  ;;  %v72_v13 = vld [vmem:[#allocation2 + $0x98] sm:$0xff]  ;;  %v2810_v15 = vcombine.low %v55_v63, %v63_v1  ;;  %v2812_v16 = vcombine.low %v56_v2, %v64_v3  ;;  %v2827_v17 = vcombine.high %v71_v10, %v79_v11 }
  0x2f   :  { %v2855_v29 = vcombine.high %v101_v23, %v109_v24  ;;  %v2857_v30 = vcombine.high %v102_v25, %v110_v26  ;;  %v117_v31 = vld [vmem:[#allocation2 + $0x200] sm:$0xff]  ;;  %v118_v33 = vld [vmem:[#allocation2 + $0x208] sm:$0xff]  ;;  %v2854_v35 = vcombine.low %v101_v23, %v109_v24  ;;  %v2856_v36 = vcombine.low %v102_v25, %v110_v26  ;;  %v80_v14 = vld [vmem:[#allocation2 + $0xd8] sm:$0xff] }
  0x30   :  { %824 = vmatpush1.bf16.msra.mxu0 %v2822_v19  ;;  %867 = vmatpush1.bf16.msra.mxu1 %v2824_v20  ;;  %v125_v32 = vld [vmem:[#allocation2 + $0x240] sm:$0xff]  ;;  %v126_v34 = vld [vmem:[#allocation2 + $0x248] sm:$0xff]  ;;  %v2829_v18 = vcombine.high %v72_v13, %v80_v14  ;;  %v87_v19 = vld [vmem:[#allocation2 + $0x110] sm:$0xff]  ;;  %v2826_v23 = vcombine.low %v71_v10, %v79_v11  ;;  %v2828_v24 = vcombine.low %v72_v13, %v80_v14 }
  0x31   :  { %825 = vmatprep.subr.bf16.mxu0 %v2839_v21  ;;  %868 = vmatprep.subr.bf16.mxu1 %v2841_v22  ;;  %v2871_v37 = vcombine.high %v117_v31, %v125_v32  ;;  %v2873_v38 = vcombine.high %v118_v33, %v126_v34  ;;  %v133_v39 = vld [vmem:[#allocation2 + $0x280] sm:$0xff]  ;;  %v134_v41 = vld [vmem:[#allocation2 + $0x288] sm:$0xff]  ;;  %v2870_v43 = vcombine.low %v117_v31, %v125_v32  ;;  %v95_v20 = vld [vmem:[#allocation2 + $0x150] sm:$0xff] }
  0x32   :  { %v141_v40 = vld [vmem:[#allocation2 + $0x2c0] sm:$0xff]  ;;  %v142_v42 = vld [vmem:[#allocation2 + $0x2c8] sm:$0xff]  ;;  %v2872_v44 = vcombine.low %v118_v33, %v126_v34  ;;  %v88_v21 = vld [vmem:[#allocation2 + $0x118] sm:$0xff]  ;;  %v2843_v25 = vcombine.high %v87_v19, %v95_v20  ;;  %v2842_v31 = vcombine.low %v87_v19, %v95_v20 }
  0x33   :  { %v2887_v45 = vcombine.high %v133_v39, %v141_v40  ;;  %v2889_v46 = vcombine.high %v134_v41, %v142_v42  ;;  %v149_v47 = vld [vmem:[#allocation2 + $0x300] sm:$0xff]  ;;  %v150_v49 = vld [vmem:[#allocation2 + $0x308] sm:$0xff]  ;;  %v2886_v51 = vcombine.low %v133_v39, %v141_v40  ;;  %v2888_v52 = vcombine.low %v134_v41, %v142_v42  ;;  %v96_v22 = vld [vmem:[#allocation2 + $0x158] sm:$0xff] }
  0x34   :  { %826 = vmatpush1.bf16.msra.mxu0 %v2838_v27  ;;  %869 = vmatpush1.bf16.msra.mxu1 %v2840_v28  ;;  %v157_v48 = vld [vmem:[#allocation2 + $0x340] sm:$0xff]  ;;  %v158_v50 = vld [vmem:[#allocation2 + $0x348] sm:$0xff]  ;;  %v2845_v26 = vcombine.high %v88_v21, %v96_v22  ;;  %v103_v27 = vld [vmem:[#allocation2 + $0x190] sm:$0xff]  ;;  %v2844_v32 = vcombine.low %v88_v21, %v96_v22 }
  0x35   :  { %827 = vmatprep.subr.bf16.mxu0 %v2855_v29  ;;  %870 = vmatprep.subr.bf16.mxu1 %v2857_v30  ;;  %v2903_v53 = vcombine.high %v149_v47, %v157_v48  ;;  %v2905_v54 = vcombine.high %v150_v49, %v158_v50  ;;  %v165_v55 = vld [vmem:[#allocation2 + $0x380] sm:$0xff]  ;;  %v166_v57 = vld [vmem:[#allocation2 + $0x388] sm:$0xff]  ;;  %v2902_v59 = vcombine.low %v149_v47, %v157_v48  ;;  %v111_v28 = vld [vmem:[#allocation2 + $0x1d0] sm:$0xff] }
  0x36   :  { %v173_v56 = vld [vmem:[#allocation2 + $0x3c0] sm:$0xff]  ;;  %v174_v58 = vld [vmem:[#allocation2 + $0x3c8] sm:$0xff]  ;;  %v2904_v60 = vcombine.low %v150_v49, %v158_v50  ;;  %v104_v29 = vld [vmem:[#allocation2 + $0x198] sm:$0xff]  ;;  %v2859_v33 = vcombine.high %v103_v27, %v111_v28  ;;  %v2858_v39 = vcombine.low %v103_v27, %v111_v28 }
  0x37   :  { %v2919_v61 = vcombine.high %v165_v55, %v173_v56  ;;  %v2921_v62 = vcombine.high %v166_v57, %v174_v58  ;;  %v2918_v4 = vcombine.low %v165_v55, %v173_v56  ;;  %v50_v5 = vld [vmem:[%s3613_s0] sm:$0xff]  ;;  %v51_v6 = vld [vmem:[%s3613_s0 + $0x8] sm:$0xff]  ;;  %v2920_v7 = vcombine.low %v166_v57, %v174_v58  ;;  %v112_v30 = vld [vmem:[#allocation2 + $0x1d8] sm:$0xff] }
  0x38   :  { %828 = vmatpush1.bf16.msra.mxu0 %v2854_v35  ;;  %871 = vmatpush1.bf16.msra.mxu1 %v2856_v36  ;;  %v3523_v12 = vpack.c.bf16 %v51_v6, %v50_v5  ;;  %v2861_v34 = vcombine.high %v104_v29, %v112_v30  ;;  %v119_v35 = vld [vmem:[#allocation2 + $0x210] sm:$0xff]  ;;  %v2860_v41 = vcombine.low %v104_v29, %v112_v30  ;;  %v57_v1 = vld [vmem:[#allocation2 + $0x20] sm:$0xff]  ;;  %v58_v6 = vld [vmem:[#allocation2 + $0x28] sm:$0xff] }
  0x39   :  { %829 = vmatprep.subr.bf16.mxu0 %v2871_v37  ;;  %872 = vmatprep.subr.bf16.mxu1 %v2873_v38  ;;  %v127_v36 = vld [vmem:[#allocation2 + $0x250] sm:$0xff]  ;;  %v120_v37 = vld [vmem:[#allocation2 + $0x218] sm:$0xff]  ;;  %v81_v13 = vld [vmem:[#allocation2 + $0xe0] sm:$0xff] }
  0x3a   :  { %v128_v38 = vld [vmem:[#allocation2 + $0x258] sm:$0xff]  ;;  %v135_v40 = vld [vmem:[#allocation2 + $0x290] sm:$0xff]  ;;  %v2875_v42 = vcombine.high %v119_v35, %v127_v36  ;;  %v2874_v47 = vcombine.low %v119_v35, %v127_v36  ;;  %v97_v19 = vld [vmem:[#allocation2 + $0x160] sm:$0xff] }
  0x3b   :  { %v151_v48 = vld [vmem:[#allocation2 + $0x310] sm:$0xff]  ;;  %v2876_v49 = vcombine.low %v120_v37, %v128_v38  ;;  %v90_v22 = vld [vmem:[#allocation2 + $0x128] sm:$0xff]  ;;  %v113_v27 = vld [vmem:[#allocation2 + $0x1e0] sm:$0xff] }
  0x3c   :  { %830 = vmatpush1.bf16.msra.mxu0 %v2870_v43  ;;  %873 = vmatpush1.bf16.msra.mxu1 %v2872_v44  ;;  %v143_v43 = vld [vmem:[#allocation2 + $0x2d0] sm:$0xff]  ;;  %v2877_v44 = vcombine.high %v120_v37, %v128_v38  ;;  %v106_v30 = vld [vmem:[#allocation2 + $0x1a8] sm:$0xff]  ;;  %v129_v35 = vld [vmem:[#allocation2 + $0x260] sm:$0xff] }
  0x3d   :  { %831 = vmatprep.subr.bf16.mxu0 %v2887_v45  ;;  %874 = vmatprep.subr.bf16.mxu1 %v2889_v46  ;;  %v136_v45 = vld [vmem:[#allocation2 + $0x298] sm:$0xff]  ;;  %v2891_v50 = vcombine.high %v135_v40, %v143_v43  ;;  %v2890_v55 = vcombine.low %v135_v40, %v143_v43  ;;  %v167_v56 = vld [vmem:[#allocation2 + $0x390] sm:$0xff]  ;;  %v122_v38 = vld [vmem:[#allocation2 + $0x228] sm:$0xff] }
  0x3e   :  { %v144_v46 = vld [vmem:[#allocation2 + $0x2d8] sm:$0xff]  ;;  %v145_v43 = vld [vmem:[#allocation2 + $0x2e0] sm:$0xff] }
  0x3f   :  { %v2892_v57 = vcombine.low %v136_v45, %v144_v46 }
  0x40   :  { %832 = vmatpush1.bf16.msra.mxu0 %v2886_v51  ;;  %875 = vmatpush1.bf16.msra.mxu1 %v2888_v52  ;;  %v159_v51 = vld [vmem:[#allocation2 + $0x350] sm:$0xff]  ;;  %v2893_v52 = vcombine.high %v136_v45, %v144_v46  ;;  %v138_v46 = vld [vmem:[#allocation2 + $0x2a8] sm:$0xff] }
  0x41   :  { %833 = vmatprep.subr.bf16.mxu0 %v2903_v53  ;;  %876 = vmatprep.subr.bf16.mxu1 %v2905_v54  ;;  %v152_v53 = vld [vmem:[#allocation2 + $0x318] sm:$0xff]  ;;  %v2907_v58 = vcombine.high %v151_v48, %v159_v51  ;;  %v2906_v63 = vcombine.low %v151_v48, %v159_v51  ;;  %v161_v51 = vld [vmem:[#allocation2 + $0x360] sm:$0xff] }
  0x42   :  { %v160_v54 = vld [vmem:[#allocation2 + $0x358] sm:$0xff] }
  0x43   :  { %v2908_v2 = vcombine.low %v152_v53, %v160_v54 }
  0x44   :  { %834 = vmatpush1.bf16.msra.mxu0 %v2902_v59  ;;  %877 = vmatpush1.bf16.msra.mxu1 %v2904_v60  ;;  %v175_v59 = vld [vmem:[#allocation2 + $0x3d0] sm:$0xff]  ;;  %v2909_v60 = vcombine.high %v152_v53, %v160_v54  ;;  %v154_v54 = vld [vmem:[#allocation2 + $0x328] sm:$0xff] }
  0x45   :  { %835 = vmatprep.subr.bf16.mxu0 %v2919_v61  ;;  %878 = vmatprep.subr.bf16.mxu1 %v2921_v62  ;;  %v168_v61 = vld [vmem:[#allocation2 + $0x398] sm:$0xff]  ;;  %v2923_v3 = vcombine.high %v167_v56, %v175_v59 }
  0x46   :  { %v176_v62 = vld [vmem:[#allocation2 + $0x3d8] sm:$0xff] }
  0x47   :  { %v2925_v5 = vcombine.high %v168_v61, %v176_v62  ;;  %v2924_v10 = vcombine.low %v168_v61, %v176_v62  ;;  %v170_v62 = vld [vmem:[#allocation2 + $0x3a8] sm:$0xff] }
  0x48   :  { %836 = vmatpush1.bf16.msra.mxu0 %v2918_v4  ;;  %879 = vmatpush1.bf16.msra.mxu1 %v2920_v7  ;;  %v65_v4 = vld [vmem:[#allocation2 + $0x60] sm:$0xff]  ;;  %v66_v7 = vld [vmem:[#allocation2 + $0x68] sm:$0xff] }
  0x49   :  { %907 = vmatprep.subr.bf16.mxu0 %v2811_v8  ;;  %950 = vmatprep.subr.bf16.mxu1 %v2813_v9  ;;  %v2922_v8 = vcombine.low %v167_v56, %v175_v59  ;;  %v73_v9 = vld [vmem:[#allocation2 + $0xa0] sm:$0xff]  ;;  %v2815_v11 = vcombine.high %v57_v1, %v65_v4  ;;  %v2817_v14 = vcombine.high %v58_v6, %v66_v7 }
  0x4a   :  { %v2816_v20 = vcombine.low %v58_v6, %v66_v7  ;;  %v2831_v21 = vcombine.high %v73_v9, %v81_v13  ;;  %v177_v59 = vld [vmem:[#allocation2 + $0x3e0] sm:$0xff]  ;;  %v60_v7 = vld [vmem:[#allocation2 + $0x38] sm:$0xff] }
  0x4b   :  { %854 = vmatmul.mubr.bf16.vlgmr.msra.gmra.mrb[0].mxu0 %v3523_v12  ;;  %897 = vmatmul.mubr.bf16.vlgmr.msra.gmra.mrb[0].mxu1 %v3523_v12 }
  0x4c   :  { %908 = vmatpush1.bf16.msra.mxu0 %v2810_v15  ;;  %951 = vmatpush1.bf16.msra.mxu1 %v2812_v16  ;;  %v74_v15 = vld [vmem:[#allocation2 + $0xa8] sm:$0xff] }
  0x4d   :  { %909 = vmatprep.subr.bf16.mxu0 %v2827_v17  ;;  %952 = vmatprep.subr.bf16.mxu1 %v2829_v18  ;;  %v82_v16 = vld [vmem:[#allocation2 + $0xe8] sm:$0xff]  ;;  %v2814_v17 = vcombine.low %v57_v1, %v65_v4  ;;  %v89_v18 = vld [vmem:[#allocation2 + $0x120] sm:$0xff]  ;;  %v67_v4 = vld [vmem:[#allocation2 + $0x70] sm:$0xff] }
  0x4e   :  { %939 = vmatprep.mubr.bf16.mxu0 %v3456_v0  ;;  %982 = vmatprep.mubr.bf16.mxu1 %v3456_v0  ;;  %v2832_v28 = vcombine.low %v74_v15, %v82_v16  ;;  %v2847_v29 = vcombine.high %v89_v18, %v97_v19 }
  0x50   :  { %910 = vmatpush1.bf16.msra.mxu0 %v2826_v23  ;;  %953 = vmatpush1.bf16.msra.mxu1 %v2828_v24  ;;  %v98_v23 = vld [vmem:[#allocation2 + $0x168] sm:$0xff]  ;;  %v2833_v24 = vcombine.high %v74_v15, %v82_v16  ;;  %v76_v16 = vld [vmem:[#allocation2 + $0xb8] sm:$0xff] }
  0x51   :  { %911 = vmatprep.subr.bf16.mxu0 %v2843_v25  ;;  %954 = vmatprep.subr.bf16.mxu1 %v2845_v26  ;;  %v2830_v25 = vcombine.low %v73_v9, %v81_v13  ;;  %v105_v26 = vld [vmem:[#allocation2 + $0x1a0] sm:$0xff]  ;;  %v2848_v36 = vcombine.low %v90_v22, %v98_v23  ;;  %v83_v13 = vld [vmem:[#allocation2 + $0xf0] sm:$0xff] }
  0x52   :  { %v2863_v37 = vcombine.high %v105_v26, %v113_v27 }
  0x54   :  { %912 = vmatpush1.bf16.msra.mxu0 %v2842_v31  ;;  %955 = vmatpush1.bf16.msra.mxu1 %v2844_v32  ;;  %v114_v31 = vld [vmem:[#allocation2 + $0x1e8] sm:$0xff]  ;;  %v2849_v32 = vcombine.high %v90_v22, %v98_v23 }
  0x55   :  { %913 = vmatprep.subr.bf16.mxu0 %v2859_v33  ;;  %956 = vmatprep.subr.bf16.mxu1 %v2861_v34  ;;  %v2846_v33 = vcombine.low %v89_v18, %v97_v19  ;;  %v121_v34 = vld [vmem:[#allocation2 + $0x220] sm:$0xff]  ;;  %v2865_v40 = vcombine.high %v106_v30, %v114_v31 }
  0x56   :  { %v2879_v45 = vcombine.high %v121_v34, %v129_v35 }
  0x58   :  { %914 = vmatpush1.bf16.msra.mxu0 %v2858_v39  ;;  %957 = vmatpush1.bf16.msra.mxu1 %v2860_v41  ;;  %v130_v39 = vld [vmem:[#allocation2 + $0x268] sm:$0xff]  ;;  %v2862_v41 = vcombine.low %v105_v26, %v113_v27 }
  0x59   :  { %915 = vmatprep.subr.bf16.mxu0 %v2875_v42  ;;  %958 = vmatprep.subr.bf16.mxu1 %v2877_v44  ;;  %v137_v42 = vld [vmem:[#allocation2 + $0x2a0] sm:$0xff]  ;;  %v2864_v44 = vcombine.low %v106_v30, %v114_v31  ;;  %v2881_v48 = vcombine.high %v122_v38, %v130_v39 }
  0x5a   :  { %v2895_v53 = vcombine.high %v137_v42, %v145_v43 }
  0x5c   :  { %916 = vmatpush1.bf16.msra.mxu0 %v2874_v47  ;;  %959 = vmatpush1.bf16.msra.mxu1 %v2876_v49  ;;  %v146_v47 = vld [vmem:[#allocation2 + $0x2e8] sm:$0xff]  ;;  %v2878_v49 = vcombine.low %v121_v34, %v129_v35 }
  0x5d   :  { %917 = vmatprep.subr.bf16.mxu0 %v2891_v50  ;;  %960 = vmatprep.subr.bf16.mxu1 %v2893_v52  ;;  %v153_v50 = vld [vmem:[#allocation2 + $0x320] sm:$0xff]  ;;  %v2880_v52 = vcombine.low %v122_v38, %v130_v39  ;;  %v2897_v56 = vcombine.high %v138_v46, %v146_v47 }
  0x5e   :  { %v2911_v61 = vcombine.high %v153_v50, %v161_v51 }
  0x60   :  { %918 = vmatpush1.bf16.msra.mxu0 %v2890_v55  ;;  %961 = vmatpush1.bf16.msra.mxu1 %v2892_v57  ;;  %v162_v55 = vld [vmem:[#allocation2 + $0x368] sm:$0xff]  ;;  %v2894_v57 = vcombine.low %v137_v42, %v145_v43  ;;  %v132_v42 = vld [vmem:[#allocation2 + $0x278] sm:$0xff] }
  0x61   :  { %919 = vmatprep.subr.bf16.mxu0 %v2907_v58  ;;  %962 = vmatprep.subr.bf16.mxu1 %v2909_v60  ;;  %v169_v58 = vld [vmem:[#allocation2 + $0x3a0] sm:$0xff]  ;;  %v2896_v60 = vcombine.low %v138_v46, %v146_v47  ;;  %v2913_v1 = vcombine.high %v154_v54, %v162_v55 }
  0x62   :  { %v2927_v6 = vcombine.high %v169_v58, %v177_v59 }
  0x64   :  { %920 = vmatpush1.bf16.msra.mxu0 %v2906_v63  ;;  %963 = vmatpush1.bf16.msra.mxu1 %v2908_v2  ;;  %v178_v63 = vld [vmem:[#allocation2 + $0x3e8] sm:$0xff]  ;;  %v2910_v2 = vcombine.low %v153_v50, %v161_v51 }
  0x65   :  { %921 = vmatprep.subr.bf16.mxu0 %v2923_v3  ;;  %964 = vmatprep.subr.bf16.mxu1 %v2925_v5  ;;  %v59_v3 = vld [vmem:[#allocation2 + $0x30] sm:$0xff]  ;;  %v2912_v5 = vcombine.low %v154_v54, %v162_v55  ;;  %v2929_v9 = vcombine.high %v170_v62, %v178_v63 }
  0x66   :  { %v2819_v15 = vcombine.high %v59_v3, %v67_v4  ;;  %v2818_v19 = vcombine.low %v59_v3, %v67_v4 }
  0x68   :  { %922 = vmatpush1.bf16.msra.mxu0 %v2922_v8  ;;  %965 = vmatpush1.bf16.msra.mxu1 %v2924_v10  ;;  %v68_v8 = vld [vmem:[#allocation2 + $0x78] sm:$0xff]  ;;  %v2926_v10 = vcombine.low %v169_v58, %v177_v59 }
  0x69   :  { %993 = vmatprep.subr.bf16.mxu0 %v2815_v11  ;;  %1036 = vmatprep.subr.bf16.mxu1 %v2817_v14  ;;  %v75_v11 = vld [vmem:[#allocation2 + $0xb0] sm:$0xff]  ;;  %v2928_v14 = vcombine.low %v170_v62, %v178_v63  ;;  %v2821_v18 = vcombine.high %v60_v7, %v68_v8  ;;  %v2820_v22 = vcombine.low %v60_v7, %v68_v8 }
  0x6a   :  { %v2835_v23 = vcombine.high %v75_v11, %v83_v13  ;;  %v2834_v27 = vcombine.low %v75_v11, %v83_v13  ;;  %v3250_v11 = vld [vmem:[#allocation5 + $0xc0] sm:$0xff]  }
  0x6b   :  { %940 = vmatmul.mubr.bf16.vlgmr.msra.gmra.mrb[4].mxu0 %v3523_v12  ;;  %983 = vmatmul.mubr.bf16.vlgmr.msra.gmra.mrb[4].mxu1 %v3523_v12  ;;  %v3251_v13 = vld [vmem:[#allocation5] sm:$0xff]  }
  0x6c   :  { %994 = vmatpush1.bf16.msra.mxu0 %v2814_v17  ;;  %1037 = vmatpush1.bf16.msra.mxu1 %v2816_v20  ;;  %v84_v17 = vld [vmem:[#allocation2 + $0xf8] sm:$0xff]  ;;  %v91_v20 = vld [vmem:[#allocation2 + $0x130] sm:$0xff] }
  0x6d   :  { %995 = vmatprep.subr.bf16.mxu0 %v2831_v21  ;;  %1038 = vmatprep.subr.bf16.mxu1 %v2833_v24  ;;  %v99_v21 = vld [vmem:[#allocation2 + $0x170] sm:$0xff]  ;;  %v92_v24 = vld [vmem:[#allocation2 + $0x138] sm:$0xff]  ;;  %v2837_v26 = vcombine.high %v76_v16, %v84_v17  ;;  %v2836_v30 = vcombine.low %v76_v16, %v84_v17  ;;  %v3254_v16 = vld [vmem:[#allocation5 + $0xc8] sm:$0xff]  }
  0x6e   :  { %1025 = vmatprep.mubr.bf16.mxu0 %v3456_v0  ;;  %1068 = vmatprep.mubr.bf16.mxu1 %v3456_v0  ;;  %v2851_v31 = vcombine.high %v91_v20, %v99_v21  ;;  %v2850_v35 = vcombine.low %v91_v20, %v99_v21  ;;  %v3255_v17 = vld [vmem:[#allocation5 + $0x8] sm:$0xff]   ;;  %v3258_v20 = vld [vmem:[#allocation5 + $0xd0] sm:$0xff]  }
  0x6f   :  { %v3259_v21 = vld [vmem:[#allocation5 + $0x10] sm:$0xff]  }
  0x70   :  { %996 = vmatpush1.bf16.msra.mxu0 %v2830_v25  ;;  %1039 = vmatpush1.bf16.msra.mxu1 %v2832_v28  ;;  %v100_v25 = vld [vmem:[#allocation2 + $0x178] sm:$0xff]  ;;  %v107_v28 = vld [vmem:[#allocation2 + $0x1b0] sm:$0xff] }
  0x71   :  { %997 = vmatprep.subr.bf16.mxu0 %v2847_v29  ;;  %1040 = vmatprep.subr.bf16.mxu1 %v2849_v32  ;;  %v115_v29 = vld [vmem:[#allocation2 + $0x1f0] sm:$0xff]  ;;  %v108_v32 = vld [vmem:[#allocation2 + $0x1b8] sm:$0xff]  ;;  %v2853_v34 = vcombine.high %v92_v24, %v100_v25  ;;  %v2852_v38 = vcombine.low %v92_v24, %v100_v25 }
  0x72   :  { %v2867_v39 = vcombine.high %v107_v28, %v115_v29  ;;  %v2866_v43 = vcombine.low %v107_v28, %v115_v29  ;;  %v3262_v24 = vld [vmem:[#allocation5 + $0xd8] sm:$0xff]   ;;  %v3267_v28 = vld [vmem:[#allocation5 + $0x20] sm:$0xff]  }
  0x73   :  { %v3263_v25 = vld [vmem:[#allocation5 + $0x18] sm:$0xff]   ;;  %v3268_v29 = vld [vmem:[#allocation5 + $0xa0] sm:$0xff]  }
  0x74   :  { %998 = vmatpush1.bf16.msra.mxu0 %v2846_v33  ;;  %1041 = vmatpush1.bf16.msra.mxu1 %v2848_v36  ;;  %v116_v33 = vld [vmem:[#allocation2 + $0x1f8] sm:$0xff]  ;;  %v123_v36 = vld [vmem:[#allocation2 + $0x230] sm:$0xff] }
  0x75   :  { %999 = vmatprep.subr.bf16.mxu0 %v2863_v37  ;;  %1042 = vmatprep.subr.bf16.mxu1 %v2865_v40  ;;  %v131_v37 = vld [vmem:[#allocation2 + $0x270] sm:$0xff]  ;;  %v124_v40 = vld [vmem:[#allocation2 + $0x238] sm:$0xff]  ;;  %v2868_v46 = vcombine.low %v108_v32, %v116_v33 }
  0x76   :  { %v2883_v47 = vcombine.high %v123_v36, %v131_v37  ;;  %v2885_v50 = vcombine.high %v124_v40, %v132_v42  ;;  %v2882_v51 = vcombine.low %v123_v36, %v131_v37  ;;  %v2884_v54 = vcombine.low %v124_v40, %v132_v42  ;;  %v3275_v36 = vld [vmem:[#allocation5 + $0x30] sm:$0xff]   ;;  %v3279_v40 = vld [vmem:[#allocation5 + $0x38] sm:$0xff]   ;;  %v3281_v42 = vld [vmem:[#allocation5 + $0x140] sm:$0xff]  }
  0x77   :  { %v3276_v37 = vld [vmem:[#allocation5 + $0xb0] sm:$0xff]  }
  0x78   :  { %1000 = vmatpush1.bf16.msra.mxu0 %v2862_v41  ;;  %1043 = vmatpush1.bf16.msra.mxu1 %v2864_v44  ;;  %v2869_v41 = vcombine.high %v108_v32, %v116_v33  ;;  %v139_v44 = vld [vmem:[#allocation2 + $0x2b0] sm:$0xff]  ;;  %v3271_v32 = vld [vmem:[#allocation5 + $0x28] sm:$0xff]  }
  0x79   :  { %1001 = vmatprep.subr.bf16.mxu0 %v2879_v45  ;;  %1044 = vmatprep.subr.bf16.mxu1 %v2881_v48  ;;  %v147_v45 = vld [vmem:[#allocation2 + $0x2f0] sm:$0xff]  ;;  %v140_v48 = vld [vmem:[#allocation2 + $0x2b8] sm:$0xff]  ;;  %v3272_v33 = vld [vmem:[#allocation5 + $0xa8] sm:$0xff]  }
  0x7a   :  { %v2899_v55 = vcombine.high %v139_v44, %v147_v45  ;;  %v2898_v59 = vcombine.low %v139_v44, %v147_v45  ;;  %v3457_v44 = vmov 1966171168  }
  0x7b   :  { %v1187_v45 = vunpack.c.l.s4 %v3457_v44  ;;  %v3299_v44 = vld [vmem:[#allocation5 + $0x120] sm:$0xff]  }
  0x7c   :  { %1002 = vmatpush1.bf16.msra.mxu0 %v2878_v49  ;;  %1045 = vmatpush1.bf16.msra.mxu1 %v2880_v52  ;;  %v148_v49 = vld [vmem:[#allocation2 + $0x2f8] sm:$0xff]  ;;  %v155_v52 = vld [vmem:[#allocation2 + $0x330] sm:$0xff] }
  0x7d   :  { %1003 = vmatprep.subr.bf16.mxu0 %v2895_v53  ;;  %1046 = vmatprep.subr.bf16.mxu1 %v2897_v56  ;;  %v163_v53 = vld [vmem:[#allocation2 + $0x370] sm:$0xff]  ;;  %v156_v56 = vld [vmem:[#allocation2 + $0x338] sm:$0xff]  ;;  %v2901_v58 = vcombine.high %v140_v48, %v148_v49  ;;  %v2900_v62 = vcombine.low %v140_v48, %v148_v49 }
  0x7e   :  { %v2915_v63 = vcombine.high %v155_v52, %v163_v53  ;;  %v2914_v4 = vcombine.low %v155_v52, %v163_v53 }
  0x80   :  { %1004 = vmatpush1.bf16.msra.mxu0 %v2894_v57  ;;  %1047 = vmatpush1.bf16.msra.mxu1 %v2896_v60  ;;  %v164_v57 = vld [vmem:[#allocation2 + $0x378] sm:$0xff]  ;;  %v171_v60 = vld [vmem:[#allocation2 + $0x3b0] sm:$0xff] }
  0x81   :  { %1005 = vmatprep.subr.bf16.mxu0 %v2911_v61  ;;  %1048 = vmatprep.subr.bf16.mxu1 %v2913_v1  ;;  %v179_v61 = vld [vmem:[#allocation2 + $0x3f0] sm:$0xff]  ;;  %v172_v1 = vld [vmem:[#allocation2 + $0x3b8] sm:$0xff]  ;;  %v2917_v3 = vcombine.high %v156_v56, %v164_v57 }
  0x82   :  { %v2930_v8 = vcombine.low %v171_v60, %v179_v61 }
  0x84   :  { %1006 = vmatpush1.bf16.msra.mxu0 %v2910_v2  ;;  %1049 = vmatpush1.bf16.msra.mxu1 %v2912_v5  ;;  %v180_v2 = vld [vmem:[#allocation2 + $0x3f8] sm:$0xff]  ;;  %v2916_v5 = vcombine.low %v156_v56, %v164_v57 }
  0x85   :  { %1007 = vmatprep.subr.bf16.mxu0 %v2927_v6  ;;  %1050 = vmatprep.subr.bf16.mxu1 %v2929_v9  ;;  %v2931_v6 = vcombine.high %v171_v60, %v179_v61  ;;  %v2933_v7 = vcombine.high %v172_v1, %v180_v2  ;;  %v2932_v9 = vcombine.low %v172_v1, %v180_v2 }
  0x88   :  { %1008 = vmatpush1.bf16.msra.mxu0 %v2926_v10  ;;  %1051 = vmatpush1.bf16.msra.mxu1 %v2928_v14  ;;  %v3249_v10 = vld [vmem:[#allocation5 + $0x40] sm:$0xff]  }
  0x89   :  { %1079 = vmatprep.subr.bf16.mxu0 %v2819_v15  ;;  %1122 = vmatprep.subr.bf16.mxu1 %v2821_v18  ;;  %v3252_v14 = vld [vmem:[#allocation5 + $0x80] sm:$0xff]   ;;  %v3253_v15 = vld [vmem:[#allocation5 + $0x48] sm:$0xff]  }
  0x8a   :  { %v3256_v18 = vld [vmem:[#allocation5 + $0x88] sm:$0xff]  }
  0x8b   :  { %1026 = vmatmul.mubr.bf16.vlgmr.msra.gmra.mrb[8].mxu0 %v3523_v12  ;;  %1069 = vmatmul.mubr.bf16.vlgmr.msra.gmra.mrb[8].mxu1 %v3523_v12 }
  0x8c   :  { %1080 = vmatpush1.bf16.msra.mxu0 %v2818_v19  ;;  %1123 = vmatpush1.bf16.msra.mxu1 %v2820_v22  ;;  %v3257_v19 = vld [vmem:[#allocation5 + $0x50] sm:$0xff]  }
  0x8d   :  { %1081 = vmatprep.subr.bf16.mxu0 %v2835_v23  ;;  %1124 = vmatprep.subr.bf16.mxu1 %v2837_v26  ;;  %v3260_v22 = vld [vmem:[#allocation5 + $0x90] sm:$0xff]   ;;  %v3261_v23 = vld [vmem:[#allocation5 + $0x58] sm:$0xff]  }
  0x8e   :  { %1111 = vmatprep.mubr.bf16.mxu0 %v3456_v0  ;;  %1154 = vmatprep.mubr.bf16.mxu1 %v3456_v0  ;;  %v3264_v26 = vld [vmem:[#allocation5 + $0x98] sm:$0xff]  }
  0x90   :  { %1082 = vmatpush1.bf16.msra.mxu0 %v2834_v27  ;;  %1125 = vmatpush1.bf16.msra.mxu1 %v2836_v30  ;;  %v3265_v27 = vld [vmem:[#allocation5 + $0x60] sm:$0xff]   ;;  %v3269_v30 = vld [vmem:[#allocation5 + $0x68] sm:$0xff]  }
  0x91   :  { %1083 = vmatprep.subr.bf16.mxu0 %v2851_v31  ;;  %1126 = vmatprep.subr.bf16.mxu1 %v2853_v34  ;;  %v3270_v31 = vld [vmem:[#allocation5 + $0xe8] sm:$0xff]   ;;  %v3273_v34 = vld [vmem:[#allocation5 + $0x70] sm:$0xff]  }
  0x94   :  { %1084 = vmatpush1.bf16.msra.mxu0 %v2850_v35  ;;  %1127 = vmatpush1.bf16.msra.mxu1 %v2852_v38  ;;  %v3274_v35 = vld [vmem:[#allocation5 + $0xf0] sm:$0xff]   ;;  %v3277_v38 = vld [vmem:[#allocation5 + $0x78] sm:$0xff]  }
  0x95   :  { %1085 = vmatprep.subr.bf16.mxu0 %v2867_v39  ;;  %1128 = vmatprep.subr.bf16.mxu1 %v2869_v41  ;;  %v3278_v39 = vld [vmem:[#allocation5 + $0xf8] sm:$0xff]  }
  0x96   :  { %v3280_v41 = vld [vmem:[#allocation5 + $0xb8] sm:$0xff]  }
  0x98   :  { %1086 = vmatpush1.bf16.msra.mxu0 %v2866_v43  ;;  %1129 = vmatpush1.bf16.msra.mxu1 %v2868_v46  ;;  %v3282_v43 = vld [vmem:[#allocation5 + $0x1c0] sm:$0xff]   ;;  %v1189_v46 = vlaneseq }
  0x99   :  { %1087 = vmatprep.subr.bf16.mxu0 %v2883_v47  ;;  %1130 = vmatprep.subr.bf16.mxu1 %v2885_v50  ;;  %v1188_v47 = vunpack.c.0.s8 %v1187_v45  ;;  %v1181_v50 = vld [vmem:[%s3615_s2] sm:$0xff] }
  0x9a   :  { %v1190_v48 = vshrl.u32 %v1189_v46, 7  ;;  %v3300_v45 = vld [vmem:[#allocation5 + $0x1a0] sm:$0xff]   ;;  %v3301_v46 = vld [vmem:[#allocation5 + $0x168] sm:$0xff]  }
  0x9c   :  { %1088 = vmatpush1.bf16.msra.mxu0 %v2882_v51  ;;  %1131 = vmatpush1.bf16.msra.mxu1 %v2884_v54  ;;  %v3539_v49 = vsub.s32 %v1188_v47, %v1190_v48  ;;  %v3302_v47 = vld [vmem:[#allocation5 + $0x1e8] sm:$0xff]  }
  0x9d   :  { %1089 = vmatprep.subr.bf16.mxu0 %v2899_v55  ;;  %1132 = vmatprep.subr.bf16.mxu1 %v2901_v58  ;;  %v3547_v58 = vsub.s32 0, %v1190_v48 }
  0x9e   :  { %v1192_v51 = vrot.slane %v1181_v50, %v3539_v49 }
  0xa0   :  { %1090 = vmatpush1.bf16.msra.mxu0 %v2898_v59  ;;  %1133 = vmatpush1.bf16.msra.mxu1 %v2900_v62  ;;  %v1200_v52 = vcombine.high %v1192_v51, %v1192_v51  ;;  %v1208_v53 = vrot.slane %v1192_v51, %v3539_v49  ;;  %v3303_v51 = vld [vmem:[#allocation5 + $0x128] sm:$0xff]  }
  0xa1   :  { %1091 = vmatprep.subr.bf16.mxu0 %v2915_v63  ;;  %1134 = vmatprep.subr.bf16.mxu1 %v2917_v3 }
  0xa2   :  { %v1222_v54 = vrot.slane %v1200_v52, %v3539_v49  ;;  %v1230_v55 = vcombine.high %v1208_v53, %v1208_v53  ;;  %v1284_v57 = vpack.i.b16 %v1208_v53, %v1208_v53  ;;  %v3304_v52 = vld [vmem:[#allocation5 + $0x1a8] sm:$0xff]  }
  0xa4   :  { %1092 = vmatpush1.bf16.msra.mxu0 %v2914_v4  ;;  %1135 = vmatpush1.bf16.msra.mxu1 %v2916_v5  ;;  %v1232_v56 = vcombine.high %v1222_v54, %v1222_v54  ;;  %v1298_v59 = vpack.i.b16 %v1230_v55, %v1230_v55  ;;  %v1291_v60 = vpack.i.b16 %v1222_v54, %v1222_v54  ;;  %v3306_v54 = vld [vmem:[#allocation5 + $0x170] sm:$0xff]  }
  0xa5   :  { %1093 = vmatprep.subr.bf16.mxu0 %v2931_v6  ;;  %1136 = vmatprep.subr.bf16.mxu1 %v2933_v7  ;;  %v1289_v2 = vrot.slane %v1284_v57, %v3547_v58  ;;  %v3307_v57 = vld [vmem:[#allocation5 + $0x1f0] sm:$0xff]  }
  0xa6   :  { %v1305_v61 = vpack.i.b16 %v1232_v56, %v1232_v56  ;;  %v1303_v5 = vrot.slane %v1298_v59, %v3547_v58  ;;  %v1296_v6 = vrot.slane %v1291_v60, %v3547_v58 }
  0xa8   :  { %1094 = vmatpush1.bf16.msra.mxu0 %v2930_v8  ;;  %1137 = vmatpush1.bf16.msra.mxu1 %v2932_v9 }
  0xa9   :  { %3063 = vmatprep.subr.bf16.mxu0 %v3249_v10  ;;  %3085 = vmatprep.subr.bf16.mxu1 %v3250_v11  ;;  %v1310_v10 = vrot.slane %v1305_v61, %v3547_v58  ;;  %v3308_v61 = vld [vmem:[#allocation5 + $0x130] sm:$0xff]  }
  0xab   :  { %1112 = vmatmul.mubr.bf16.vlgmr.msra.gmra.mrb[12].mxu0 %v3523_v12  ;;  %1155 = vmatmul.mubr.bf16.vlgmr.msra.gmra.mrb[12].mxu1 %v3523_v12  ;;  %v3266_v12 = vld [vmem:[#allocation5 + $0xe0] sm:$0xff]  }
  0xac   :  { %3064 = vmatpush3.bf16.msra.mxu0 %v3251_v13  ;;  %3086 = vmatpush3.bf16.msra.mxu1 %v3252_v14 }
  0xad   :  { %3065 = vmatprep.subr.bf16.mxu0 %v3253_v15  ;;  %3087 = vmatprep.subr.bf16.mxu1 %v3254_v16 }
  0xb0   :  { %3066 = vmatpush3.bf16.msra.mxu0 %v3255_v17  ;;  %3088 = vmatpush3.bf16.msra.mxu1 %v3256_v18 }
  0xb1   :  { %3067 = vmatprep.subr.bf16.mxu0 %v3257_v19  ;;  %3089 = vmatprep.subr.bf16.mxu1 %v3258_v20 }
  0xb4   :  { %3068 = vmatpush3.bf16.msra.mxu0 %v3259_v21  ;;  %3090 = vmatpush3.bf16.msra.mxu1 %v3260_v22  ;;  %v3283_v22 = vld [vmem:[#allocation5 + $0x100] sm:$0xff]  }
  0xb5   :  { %3069 = vmatprep.subr.bf16.mxu0 %v3261_v23  ;;  %3091 = vmatprep.subr.bf16.mxu1 %v3262_v24 }
  0xb8   :  { %3070 = vmatpush3.bf16.msra.mxu0 %v3263_v25  ;;  %3092 = vmatpush3.bf16.msra.mxu1 %v3264_v26  ;;  %v3284_v25 = vld [vmem:[#allocation5 + $0x180] sm:$0xff]   ;;  %v3285_v26 = vld [vmem:[#allocation5 + $0x148] sm:$0xff]  }
  0xb9   :  { %3071 = vmatprep.subr.bf16.mxu0 %v3265_v27  ;;  %3093 = vmatprep.subr.bf16.mxu1 %v3266_v12  ;;  %v3286_v27 = vld [vmem:[#allocation5 + $0x1c8] sm:$0xff]   ;;  %v1185_v12 = vcombine.high %v1181_v50, %v1181_v50 }
  0xbc   :  { %3072 = vmatpush3.bf16.msra.mxu0 %v3267_v28  ;;  %3094 = vmatpush3.bf16.msra.mxu1 %v3268_v29  ;;  %v3287_v28 = vld [vmem:[#allocation5 + $0x108] sm:$0xff]  }
  0xbd   :  { %3073 = vmatprep.subr.bf16.mxu0 %v3269_v30  ;;  %3095 = vmatprep.subr.bf16.mxu1 %v3270_v31  ;;  %v3288_v29 = vld [vmem:[#allocation5 + $0x188] sm:$0xff]   ;;  %v3289_v30 = vld [vmem:[#allocation5 + $0x150] sm:$0xff]  }
  0xbe   :  { %v3290_v31 = vld [vmem:[#allocation5 + $0x1d0] sm:$0xff]  }
  0xc0   :  { %3074 = vmatpush3.bf16.msra.mxu0 %v3271_v32  ;;  %3096 = vmatpush3.bf16.msra.mxu1 %v3272_v33  ;;  %v1199_v32 = vrot.slane %v1185_v12, %v3539_v49  ;;  %v3291_v33 = vld [vmem:[#allocation5 + $0x110] sm:$0xff]   ;;  %v3316_v12 = vld [vmem:[#allocation5 + $0x200] sm:$0xff]  }
  0xc1   :  { %3075 = vmatprep.subr.bf16.mxu0 %v3273_v34  ;;  %3097 = vmatprep.subr.bf16.mxu1 %v3274_v35  ;;  %v3292_v34 = vld [vmem:[#allocation5 + $0x190] sm:$0xff]   ;;  %v3293_v35 = vld [vmem:[#allocation5 + $0x158] sm:$0xff]  }
  0xc4   :  { %3076 = vmatpush3.bf16.msra.mxu0 %v3275_v36  ;;  %3098 = vmatpush3.bf16.msra.mxu1 %v3276_v37  ;;  %v3294_v36 = vld [vmem:[#allocation5 + $0x1d8] sm:$0xff]   ;;  %v1201_v37 = vcombine.high %v1199_v32, %v1199_v32 }
  0xc5   :  { %3077 = vmatprep.subr.bf16.mxu0 %v3277_v38  ;;  %3099 = vmatprep.subr.bf16.mxu1 %v3278_v39  ;;  %v3295_v38 = vld [vmem:[#allocation5 + $0x118] sm:$0xff]  }
  0xc6   :  { %v3296_v39 = vld [vmem:[#allocation5 + $0x198] sm:$0xff]  }
  0xc8   :  { %3078 = vmatpush3.bf16.msra.mxu0 %v3279_v40  ;;  %3100 = vmatpush3.bf16.msra.mxu1 %v3280_v41  ;;  %v3297_v40 = vld [vmem:[#allocation5 + $0x160] sm:$0xff]  }
  0xc9   :  { %3107 = vmatprep.subr.bf16.mxu0 %v3281_v42  ;;  %3129 = vmatprep.subr.bf16.mxu1 %v3282_v43  ;;  %v3298_v41 = vld [vmem:[#allocation5 + $0x1e0] sm:$0xff]   ;;  %v1215_v42 = vrot.slane %v1199_v32, %v3539_v49  ;;  %v1229_v43 = vrot.slane %v1201_v37, %v3539_v49  ;;  %v3319_v32 = vld [vmem:[#allocation5 + $0x2c8] sm:$0xff]   ;;  %v3323_v37 = vld [vmem:[#allocation5 + $0x2d0] sm:$0xff]  }
  0xcb   :  { %v1231_v48 = vcombine.high %v1215_v42, %v1215_v42  ;;  %v1233_v50 = vcombine.high %v1229_v43, %v1229_v43  ;;  %v1312_v53 = vpack.i.b16 %v1215_v42, %v1215_v42  ;;  %v1319_v56 = vpack.i.b16 %v1229_v43, %v1229_v43  ;;  %v3327_v42 = vld [vmem:[#allocation5 + $0x2d8] sm:$0xff]  }
  0xcd   :  { %v1326_v55 = vpack.i.b16 %v1231_v48, %v1231_v48  ;;  %v1333_v59 = vpack.i.b16 %v1233_v50, %v1233_v50 }
 0x11e   :  { %v855_v62 = vpop.f32.mrb[0].mxu0  ;;  %v898_v63 = vpop.f32.mrb[0].mxu1 }
 0x11f   :  { %v857_v1 = vpop.f32.mrb[1].mxu0  ;;  %v900_v3 = vpop.f32.mrb[1].mxu1 }
 0x120   :  { %v859_v4 = vpop.f32.mrb[2].mxu0  ;;  %v902_v8 = vpop.f32.mrb[2].mxu1 }
 0x121   :  { %v1165_v7 = vpack.c.bf16 %v859_v4, %v855_v62  ;;  %v861_v9 = vpop.f32.mrb[3].mxu0  ;;  %v1167_v11 = vpack.c.bf16 %v902_v8, %v898_v63  ;;  %v904_v14 = vpop.f32.mrb[3].mxu1  ;;  %v3311_v8 = vld [vmem:[#allocation5 + $0x1f8] sm:$0xff]  }
 0x122   :  { %v1166_v13 = vpack.c.bf16 %v861_v9, %v857_v1  ;;  %v1168_v16 = vpack.c.bf16 %v904_v14, %v900_v3  ;;  %v1317_v1 = vrot.slane %v1312_v53, %v3547_v58  ;;  %v3310_v3 = vld [vmem:[#allocation5 + $0x178] sm:$0xff]   ;;  %v3334_v53 = vld [vmem:[#allocation5 + $0x268] sm:$0xff]  }
 0x123   :  { %v1395_v15 = vadd.bf16 %v1289_v2, %v1165_v7  ;;  %v1397_v17 = vadd.bf16 %v1303_v5, %v1167_v11  ;;  %v3309_v2 = vld [vmem:[#allocation5 + $0x1b0] sm:$0xff]   ;;  %v1324_v7 = vrot.slane %v1319_v56, %v3547_v58 }
 0x124   :  { %v1396_v18 = vadd.bf16 %v1296_v6, %v1166_v13  ;;  %v1398_v19 = vadd.bf16 %v1310_v10, %v1168_v16  ;;  %v1331_v6 = vrot.slane %v1326_v55, %v3547_v58  ;;  %v1338_v13 = vrot.slane %v1333_v59, %v3547_v58  ;;  %v3337_v59 = vld [vmem:[#allocation5 + $0x2a8] sm:$0xff]  }
 0x125   :  { %v1413_v20 = vmax.bf16 %v3456_v0, %v1397_v17  ;;  %v1411_v23 = vmax.bf16 %v3456_v0, %v1395_v15  ;;  %v3312_v17 = vld [vmem:[#allocation5 + $0x138] sm:$0xff]  }
 0x126   :  { %v1412_v21 = vmax.bf16 %v3456_v0, %v1396_v18  ;;  %v1414_v24 = vmax.bf16 %v3456_v0, %v1398_v19 }
 0x128   :  { %2490 = vmatprep.mubr.bf16.mxu0 %v1412_v21  ;;  %2531 = vmatprep.mubr.bf16.mxu1 %v1414_v24  ;;  %v3314_v21 = vld [vmem:[#allocation5 + $0x240] sm:$0xff]  }
 0x129   :  { %2491 = vmatmul.mubr.bf16.vlgmr.msra.gmra.mrb[16].mxu0 %v1411_v23  ;;  %2532 = vmatmul.mubr.bf16.vlgmr.msra.gmra.mrb[16].mxu1 %v1413_v20  ;;  %v3313_v20 = vld [vmem:[#allocation5 + $0x1b8] sm:$0xff]   ;;  %v3315_v24 = vld [vmem:[#allocation5 + $0x2c0] sm:$0xff]  }
 0x12a   :  { %3108 = vmatpush3.bf16.msra.mxu0 %v3283_v22  ;;  %3130 = vmatpush3.bf16.msra.mxu1 %v3284_v25 }
 0x12b   :  { %3109 = vmatprep.subr.bf16.mxu0 %v3285_v26  ;;  %3131 = vmatprep.subr.bf16.mxu1 %v3286_v27 }
 0x12e   :  { %3110 = vmatpush3.bf16.msra.mxu0 %v3287_v28  ;;  %3132 = vmatpush3.bf16.msra.mxu1 %v3288_v29 }
 0x12f   :  { %3111 = vmatprep.subr.bf16.mxu0 %v3289_v30  ;;  %3133 = vmatprep.subr.bf16.mxu1 %v3290_v31  ;;  %v3317_v30 = vld [vmem:[#allocation5 + $0x280] sm:$0xff]   ;;  %v3318_v31 = vld [vmem:[#allocation5 + $0x248] sm:$0xff]  }
 0x132   :  { %3112 = vmatpush3.bf16.msra.mxu0 %v3291_v33  ;;  %3134 = vmatpush3.bf16.msra.mxu1 %v3292_v34  ;;  %v3320_v33 = vld [vmem:[#allocation5 + $0x208] sm:$0xff]  }
 0x133   :  { %3113 = vmatprep.subr.bf16.mxu0 %v3293_v35  ;;  %3135 = vmatprep.subr.bf16.mxu1 %v3294_v36  ;;  %v3571_v34 = vld [vmem:[%s3615_s2 + $0x8] sm:$0xff]  ;;  %v3322_v36 = vld [vmem:[#allocation5 + $0x250] sm:$0xff]  }
 0x134   :  { %v3321_v35 = vld [vmem:[#allocation5 + $0x288] sm:$0xff]  }
 0x136   :  { %3114 = vmatpush3.bf16.msra.mxu0 %v3295_v38  ;;  %3136 = vmatpush3.bf16.msra.mxu1 %v3296_v39  ;;  %v1241_v38 = vrot.slane %v3571_v34, %v3539_v49  ;;  %v3324_v39 = vld [vmem:[#allocation5 + $0x210] sm:$0xff]  }
 0x137   :  { %3115 = vmatprep.subr.bf16.mxu0 %v3297_v40  ;;  %3137 = vmatprep.subr.bf16.mxu1 %v3298_v41  ;;  %v3325_v40 = vld [vmem:[#allocation5 + $0x290] sm:$0xff]   ;;  %v3326_v41 = vld [vmem:[#allocation5 + $0x258] sm:$0xff]  }
 0x138   :  { %v1249_v43 = vcombine.high %v1241_v38, %v1241_v38  ;;  %v1257_v48 = vrot.slane %v1241_v38, %v3539_v49  ;;  %v3350_v38 = vld [vmem:[#allocation5 + $0x348] sm:$0xff]  }
 0x13a   :  { %3116 = vmatpush3.bf16.msra.mxu0 %v3299_v44  ;;  %3138 = vmatpush3.bf16.msra.mxu1 %v3300_v45  ;;  %v3328_v44 = vld [vmem:[#allocation5 + $0x218] sm:$0xff]   ;;  %v1271_v50 = vrot.slane %v1249_v43, %v3539_v49  ;;  %v1279_v55 = vcombine.high %v1257_v48, %v1257_v48  ;;  %v3354_v43 = vld [vmem:[#allocation5 + $0x350] sm:$0xff]  }
 0x13b   :  { %3117 = vmatprep.subr.bf16.mxu0 %v3301_v46  ;;  %3139 = vmatprep.subr.bf16.mxu1 %v3302_v47  ;;  %v3329_v45 = vld [vmem:[#allocation5 + $0x298] sm:$0xff]   ;;  %v3330_v46 = vld [vmem:[#allocation5 + $0x260] sm:$0xff]  }
 0x13c   :  { %v3331_v47 = vld [vmem:[#allocation5 + $0x2e0] sm:$0xff]   ;;  %v1281_v56 = vcombine.high %v1271_v50, %v1271_v50 }
 0x13e   :  { %v941_v60 = vpop.f32.mrb[4].mxu0  ;;  %3118 = vmatpush3.bf16.msra.mxu0 %v3303_v51  ;;  %v984_v62 = vpop.f32.mrb[4].mxu1  ;;  %3140 = vmatpush3.bf16.msra.mxu1 %v3304_v52  ;;  %v3332_v51 = vld [vmem:[#allocation5 + $0x220] sm:$0xff]  }
 0x13f   :  { %v943_v63 = vpop.f32.mrb[5].mxu0  ;;  %3119 = vmatprep.subr.bf16.mxu0 %v3306_v54  ;;  %v986_v4 = vpop.f32.mrb[5].mxu1  ;;  %3141 = vmatprep.subr.bf16.mxu1 %v3307_v57  ;;  %v3333_v52 = vld [vmem:[#allocation5 + $0x2a0] sm:$0xff]   ;;  %v3335_v54 = vld [vmem:[#allocation5 + $0x2e8] sm:$0xff]  }
 0x140   :  { %v945_v5 = vpop.f32.mrb[6].mxu0  ;;  %v988_v10 = vpop.f32.mrb[6].mxu1  ;;  %v3336_v57 = vld [vmem:[#allocation5 + $0x228] sm:$0xff]  }
 0x141   :  { %v1169_v9 = vpack.c.bf16 %v945_v5, %v941_v60  ;;  %v947_v11 = vpop.f32.mrb[7].mxu0  ;;  %v1171_v14 = vpack.c.bf16 %v988_v10, %v984_v62  ;;  %v990_v16 = vpop.f32.mrb[7].mxu1  ;;  %v1340_v60 = vpack.i.b16 %v1257_v48, %v1257_v48  ;;  %v1354_v62 = vpack.i.b16 %v1279_v55, %v1279_v55  ;;  %v3358_v48 = vld [vmem:[#allocation5 + $0x358] sm:$0xff]  }
 0x142   :  { %v1170_v15 = vpack.c.bf16 %v947_v11, %v943_v63  ;;  %3120 = vmatpush3.bf16.msra.mxu0 %v3308_v61  ;;  %v1172_v19 = vpack.c.bf16 %v990_v16, %v986_v4  ;;  %3142 = vmatpush3.bf16.msra.mxu1 %v3309_v2  ;;  %v3338_v61 = vld [vmem:[#allocation5 + $0x270] sm:$0xff]   ;;  %v1347_v63 = vpack.i.b16 %v1271_v50, %v1271_v50  ;;  %v3359_v50 = vld [vmem:[#allocation5 + $0x3d8] sm:$0xff]  }
 0x143   :  { %v1399_v18 = vadd.bf16 %v1317_v1, %v1169_v9  ;;  %3121 = vmatprep.subr.bf16.mxu0 %v3310_v3  ;;  %v1401_v22 = vadd.bf16 %v1331_v6, %v1171_v14  ;;  %3143 = vmatprep.subr.bf16.mxu1 %v3311_v8  ;;  %v3339_v1 = vld [vmem:[#allocation5 + $0x2f0] sm:$0xff]   ;;  %v1361_v2 = vpack.i.b16 %v1281_v56, %v1281_v56  ;;  %v3342_v9 = vld [vmem:[#allocation5 + $0x278] sm:$0xff]  }
 0x144   :  { %v1400_v23 = vadd.bf16 %v1324_v7, %v1170_v15  ;;  %v1402_v25 = vadd.bf16 %v1338_v13, %v1172_v19  ;;  %v3340_v4 = vld [vmem:[#allocation5 + $0x230] sm:$0xff]   ;;  %v1345_v7 = vrot.slane %v1340_v60, %v3547_v58  ;;  %v1359_v13 = vrot.slane %v1354_v62, %v3547_v58  ;;  %v3343_v15 = vld [vmem:[#allocation5 + $0x2f8] sm:$0xff]   ;;  %v3366_v60 = vld [vmem:[#allocation5 + $0x368] sm:$0xff]  }
 0x145   :  { %v1417_v26 = vmax.bf16 %v3456_v0, %v1401_v22  ;;  %v1415_v28 = vmax.bf16 %v3456_v0, %v1399_v18  ;;  %v3341_v8 = vld [vmem:[#allocation5 + $0x2b0] sm:$0xff]   ;;  %v1352_v14 = vrot.slane %v1347_v63, %v3547_v58  ;;  %v1366_v19 = vrot.slane %v1361_v2, %v3547_v58  ;;  %v3369_v2 = vld [vmem:[#allocation5 + $0x3a8] sm:$0xff]  }
 0x146   :  { %3122 = vmatpush3.bf16.msra.mxu0 %v3312_v17  ;;  %v1416_v27 = vmax.bf16 %v3456_v0, %v1400_v23  ;;  %3144 = vmatpush3.bf16.msra.mxu1 %v3313_v20  ;;  %v1418_v29 = vmax.bf16 %v3456_v0, %v1402_v25  ;;  %v3344_v23 = vld [vmem:[#allocation5 + $0x238] sm:$0xff]  }
 0x147   :  { %3151 = vmatprep.subr.bf16.mxu0 %v3314_v21  ;;  %3173 = vmatprep.subr.bf16.mxu1 %v3315_v24 }
 0x148   :  { %2572 = vmatprep.mubr.bf16.mxu0 %v1416_v27  ;;  %2613 = vmatprep.mubr.bf16.mxu1 %v1418_v29  ;;  %v3346_v27 = vld [vmem:[#allocation5 + $0x340] sm:$0xff]  }
 0x149   :  { %2573 = vmatmul.mubr.bf16.vlgmr.msra.gmra.mrb[20].mxu0 %v1415_v28  ;;  %2614 = vmatmul.mubr.bf16.vlgmr.msra.gmra.mrb[20].mxu1 %v1417_v26  ;;  %v3345_v26 = vld [vmem:[#allocation5 + $0x2b8] sm:$0xff]   ;;  %v3347_v29 = vld [vmem:[#allocation5 + $0x3c0] sm:$0xff]  }
 0x14a   :  { %3152 = vmatpush3.bf16.msra.mxu0 %v3316_v12  ;;  %3174 = vmatpush3.bf16.msra.mxu1 %v3317_v30 }
 0x14b   :  { %3153 = vmatprep.subr.bf16.mxu0 %v3318_v31  ;;  %3175 = vmatprep.subr.bf16.mxu1 %v3319_v32 }
 0x14e   :  { %3154 = vmatpush3.bf16.msra.mxu0 %v3320_v33  ;;  %3176 = vmatpush3.bf16.msra.mxu1 %v3321_v35  ;;  %v3348_v33 = vld [vmem:[#allocation5 + $0x300] sm:$0xff]  }
 0x14f   :  { %3155 = vmatprep.subr.bf16.mxu0 %v3322_v36  ;;  %3177 = vmatprep.subr.bf16.mxu1 %v3323_v37  ;;  %v3349_v37 = vld [vmem:[#allocation5 + $0x380] sm:$0xff]  }
 0x152   :  { %3156 = vmatpush3.bf16.msra.mxu0 %v3324_v39  ;;  %3178 = vmatpush3.bf16.msra.mxu1 %v3325_v40  ;;  %v3351_v39 = vld [vmem:[#allocation5 + $0x3c8] sm:$0xff]   ;;  %v1234_v40 = vcombine.high %v3571_v34, %v3571_v34 }
 0x153   :  { %3157 = vmatprep.subr.bf16.mxu0 %v3326_v41  ;;  %3179 = vmatprep.subr.bf16.mxu1 %v3327_v42  ;;  %v3352_v41 = vld [vmem:[#allocation5 + $0x308] sm:$0xff]  }
 0x154   :  { %v3353_v42 = vld [vmem:[#allocation5 + $0x388] sm:$0xff]  }
 0x156   :  { %3158 = vmatpush3.bf16.msra.mxu0 %v3328_v44  ;;  %3180 = vmatpush3.bf16.msra.mxu1 %v3329_v45  ;;  %v3355_v44 = vld [vmem:[#allocation5 + $0x3d0] sm:$0xff]   ;;  %v1248_v45 = vrot.slane %v1234_v40, %v3539_v49  ;;  %v2934_v40 = vld [vmem:[%s3617_s4] ss:$0 sm:$0xff]  ;;  %s3458_s4 = smov [#allocation7]  }
 0x157   :  { %3159 = vmatprep.subr.bf16.mxu0 %v3330_v46  ;;  %3181 = vmatprep.subr.bf16.mxu1 %v3331_v47  ;;  %v3356_v46 = vld [vmem:[#allocation5 + $0x310] sm:$0xff]   ;;  %s2793_s26 = sshll.u32 %s3458_s4, 4  ;;  %s2794_s26 = int_to_ptr.vmem [resolvable:$true] %s2793_s26 }
 0x158   :  { %v3357_v47 = vld [vmem:[#allocation5 + $0x390] sm:$0xff]   ;;  %v1250_v34 = vcombine.high %v1248_v45, %v1248_v45  ;;  %v1264_v55 = vrot.slane %v1248_v45, %v3539_v49  ;;  %s3423_s27 = scalar_lea.vmem %s2794_s26, 256  ;;  %p3428_p3 = scmp.lt.s32.totalorder %s2794_s26, %s2794_s26 }
 0x159   :  { %p3424_p2 = scmp.ne.s32.totalorder %s2794_s26, %s3423_s27  ;;  %p3429_p4 = scmp.lt.s32.totalorder %s3423_s27, %s3423_s27 }
 0x15a   :  { %3160 = vmatpush3.bf16.msra.mxu0 %v3332_v51  ;;  %3182 = vmatpush3.bf16.msra.mxu1 %v3333_v52  ;;  %v3360_v51 = vld [vmem:[#allocation5 + $0x318] sm:$0xff]   ;;  %v1278_v56 = vrot.slane %v1250_v34, %v3539_v49  ;;  %v1280_v62 = vcombine.high %v1264_v55, %v1264_v55 }
 0x15b   :  { %3161 = vmatprep.subr.bf16.mxu0 %v3334_v53  ;;  %3183 = vmatprep.subr.bf16.mxu1 %v3335_v54  ;;  %v3361_v52 = vld [vmem:[#allocation5 + $0x398] sm:$0xff]   ;;  %v3362_v53 = vld [vmem:[#allocation5 + $0x360] sm:$0xff]   ;;  %p3430_p5 = por %p3429_p4, %p3428_p3 }
 0x15c   :  { %v3363_v54 = vld [vmem:[#allocation5 + $0x3e0] sm:$0xff]   ;;  %v1282_v63 = vcombine.high %v1278_v56, %v1278_v56  ;;  %v1375_v49 = vpack.i.b16 %v1278_v56, %v1278_v56 }
 0x15d   :  { %p3431_p6 = pnand %p3430_p5, %p3424_p2 }
 0x15e   :  { %v1027_v3 = vpop.f32.mrb[8].mxu0  ;;  %3162 = vmatpush3.bf16.msra.mxu0 %v3336_v57  ;;  %v1070_v5 = vpop.f32.mrb[8].mxu1  ;;  %3184 = vmatpush3.bf16.msra.mxu1 %v3337_v59  ;;  %v3364_v57 = vld [vmem:[#allocation5 + $0x320] sm:$0xff]  }
 0x15f   :  { %v1029_v6 = vpop.f32.mrb[9].mxu0  ;;  %3163 = vmatprep.subr.bf16.mxu0 %v3338_v61  ;;  %v1072_v10 = vpop.f32.mrb[9].mxu1  ;;  %3185 = vmatprep.subr.bf16.mxu1 %v3339_v1  ;;  %v3365_v59 = vld [vmem:[#allocation5 + $0x3a0] sm:$0xff]   ;;  %v3367_v61 = vld [vmem:[#allocation5 + $0x3e8] sm:$0xff]  }
 0x160   :  { %v1031_v11 = vpop.f32.mrb[10].mxu0  ;;  %v1074_v17 = vpop.f32.mrb[10].mxu1  ;;  %v3368_v1 = vld [vmem:[#allocation5 + $0x328] sm:$0xff]  }
 0x161   :  { %v1173_v16 = vpack.c.bf16 %v1031_v11, %v1027_v3  ;;  %v1033_v18 = vpop.f32.mrb[11].mxu0  ;;  %v1175_v20 = vpack.c.bf16 %v1074_v17, %v1070_v5  ;;  %v1076_v22 = vpop.f32.mrb[11].mxu1  ;;  %v1368_v3 = vpack.i.b16 %v1264_v55, %v1264_v55  ;;  %v1382_v5 = vpack.i.b16 %v1280_v62, %v1280_v62 }
 0x162   :  { %v1174_v21 = vpack.c.bf16 %v1033_v18, %v1029_v6  ;;  %3164 = vmatpush3.bf16.msra.mxu0 %v3340_v4  ;;  %v1176_v25 = vpack.c.bf16 %v1076_v22, %v1072_v10  ;;  %3186 = vmatpush3.bf16.msra.mxu1 %v3341_v8  ;;  %v3371_v4 = vld [vmem:[#allocation5 + $0x370] sm:$0xff]  }
 0x163   :  { %v1403_v24 = vadd.bf16 %v1345_v7, %v1173_v16  ;;  %3165 = vmatprep.subr.bf16.mxu0 %v3342_v9  ;;  %v1405_v12 = vadd.bf16 %v1359_v13, %v1175_v20  ;;  %3187 = vmatprep.subr.bf16.mxu1 %v3343_v15  ;;  %v3372_v6 = vld [vmem:[#allocation5 + $0x3f0] sm:$0xff]   ;;  %v1389_v7 = vpack.i.b16 %v1282_v63, %v1282_v63  ;;  %v3375_v15 = vld [vmem:[#allocation5 + $0x378] sm:$0xff]  }
 0x164   :  { %v1404_v28 = vadd.bf16 %v1352_v14, %v1174_v21  ;;  %v1406_v30 = vadd.bf16 %v1366_v19, %v1176_v25  ;;  %v3373_v9 = vld [vmem:[#allocation5 + $0x330] sm:$0xff]   ;;  %v1373_v13 = vrot.slane %v1368_v3, %v3547_v58  ;;  %v1387_v18 = vrot.slane %v1382_v5, %v3547_v58  ;;  %v3376_v20 = vld [vmem:[#allocation5 + $0x3f8] sm:$0xff]  }
 0x165   :  { %v1421_v31 = vmax.bf16 %v3456_v0, %v1405_v12  ;;  %v1419_v35 = vmax.bf16 %v3456_v0, %v1403_v24  ;;  %v3374_v14 = vld [vmem:[#allocation5 + $0x3b0] sm:$0xff]   ;;  %v1380_v19 = vrot.slane %v1375_v49, %v3547_v58  ;;  %v1394_v24 = vrot.slane %v1389_v7, %v3547_v58  ;;  %v3377_v12 = vld [vmem:[#allocation5 + $0x338] sm:$0xff]  }
 0x166   :  { %3166 = vmatpush3.bf16.msra.mxu0 %v3344_v23  ;;  %v1420_v32 = vmax.bf16 %v3456_v0, %v1404_v28  ;;  %3188 = vmatpush3.bf16.msra.mxu1 %v3345_v26  ;;  %v1422_v36 = vmax.bf16 %v3456_v0, %v1406_v30  ;;  %v3378_v30 = vld [vmem:[#allocation5 + $0x3b8] sm:$0xff]  }
 0x167   :  { %3195 = vmatprep.subr.bf16.mxu0 %v3346_v27  ;;  %3217 = vmatprep.subr.bf16.mxu1 %v3347_v29 }
 0x168   :  { %2654 = vmatprep.mubr.bf16.mxu0 %v1420_v32  ;;  %2695 = vmatprep.mubr.bf16.mxu1 %v1422_v36 }
 0x169   :  { %2655 = vmatmul.mubr.bf16.vlgmr.msra.gmra.mrb[24].mxu0 %v1419_v35  ;;  %2696 = vmatmul.mubr.bf16.vlgmr.msra.gmra.mrb[24].mxu1 %v1421_v31 }
 0x16a   :  { %3196 = vmatpush3.bf16.msra.mxu0 %v3348_v33  ;;  %3218 = vmatpush3.bf16.msra.mxu1 %v3349_v37 }
 0x16b   :  { %3197 = vmatprep.subr.bf16.mxu0 %v3350_v38  ;;  %3219 = vmatprep.subr.bf16.mxu1 %v3351_v39 }
 0x16e   :  { %3198 = vmatpush3.bf16.msra.mxu0 %v3352_v41  ;;  %3220 = vmatpush3.bf16.msra.mxu1 %v3353_v42 }
 0x16f   :  { %3199 = vmatprep.subr.bf16.mxu0 %v3354_v43  ;;  %3221 = vmatprep.subr.bf16.mxu1 %v3355_v44 }
 0x172   :  { %3200 = vmatpush3.bf16.msra.mxu0 %v3356_v46  ;;  %3222 = vmatpush3.bf16.msra.mxu1 %v3357_v47 }
 0x173   :  { %3201 = vmatprep.subr.bf16.mxu0 %v3358_v48  ;;  %3223 = vmatprep.subr.bf16.mxu1 %v3359_v50 }
 0x176   :  { %3202 = vmatpush3.bf16.msra.mxu0 %v3360_v51  ;;  %3224 = vmatpush3.bf16.msra.mxu1 %v3361_v52 }
 0x177   :  { %3203 = vmatprep.subr.bf16.mxu0 %v3362_v53  ;;  %3225 = vmatprep.subr.bf16.mxu1 %v3363_v54 }
 0x17a   :  { %3204 = vmatpush3.bf16.msra.mxu0 %v3364_v57  ;;  %3226 = vmatpush3.bf16.msra.mxu1 %v3365_v59 }
 0x17b   :  { %3205 = vmatprep.subr.bf16.mxu0 %v3366_v60  ;;  %3227 = vmatprep.subr.bf16.mxu1 %v3367_v61 }
 0x17e   :  { %v1113_v8 = vpop.f32.mrb[12].mxu0  ;;  %3206 = vmatpush3.bf16.msra.mxu0 %v3368_v1  ;;  %v1156_v10 = vpop.f32.mrb[12].mxu1  ;;  %3228 = vmatpush3.bf16.msra.mxu1 %v3369_v2 }
 0x17f   :  { %v1115_v11 = vpop.f32.mrb[13].mxu0  ;;  %3207 = vmatprep.subr.bf16.mxu0 %v3371_v4  ;;  %v1158_v16 = vpop.f32.mrb[13].mxu1  ;;  %3229 = vmatprep.subr.bf16.mxu1 %v3372_v6 }
 0x180   :  { %v1117_v17 = vpop.f32.mrb[14].mxu0  ;;  %v1160_v22 = vpop.f32.mrb[14].mxu1 }
 0x181   :  { %v1177_v21 = vpack.c.bf16 %v1117_v17, %v1113_v8  ;;  %v1119_v23 = vpop.f32.mrb[15].mxu0  ;;  %v1179_v25 = vpack.c.bf16 %v1160_v22, %v1156_v10  ;;  %v1162_v27 = vpop.f32.mrb[15].mxu1 }
 0x182   :  { %v1178_v26 = vpack.c.bf16 %v1119_v23, %v1115_v11  ;;  %3208 = vmatpush3.bf16.msra.mxu0 %v3373_v9  ;;  %v1180_v29 = vpack.c.bf16 %v1162_v27, %v1158_v16  ;;  %3230 = vmatpush3.bf16.msra.mxu1 %v3374_v14 }
 0x183   :  { %v1407_v28 = vadd.bf16 %v1373_v13, %v1177_v21  ;;  %3209 = vmatprep.subr.bf16.mxu0 %v3375_v15  ;;  %v1409_v31 = vadd.bf16 %v1387_v18, %v1179_v25  ;;  %3231 = vmatprep.subr.bf16.mxu1 %v3376_v20 }
 0x184   :  { %v1408_v32 = vadd.bf16 %v1380_v19, %v1178_v26  ;;  %v1410_v33 = vadd.bf16 %v1394_v24, %v1180_v29 }
 0x185   :  { %v1423_v36 = vmax.bf16 %v3456_v0, %v1407_v28  ;;  %v1425_v37 = vmax.bf16 %v3456_v0, %v1409_v31 }
 0x186   :  { %3210 = vmatpush3.bf16.msra.mxu0 %v3377_v12  ;;  %v1424_v35 = vmax.bf16 %v3456_v0, %v1408_v32  ;;  %3232 = vmatpush3.bf16.msra.mxu1 %v3378_v30  ;;  %v1426_v58 = vmax.bf16 %v3456_v0, %v1410_v33 }
 0x188   :  { %2736 = vmatprep.mubr.bf16.mxu0 %v1424_v35  ;;  %2777 = vmatprep.mubr.bf16.mxu1 %v1426_v58 }
 0x189   :  { %2737 = vmatmul.mubr.bf16.vlgmr.msra.gmra.mrb[28].mxu0 %v1423_v36  ;;  %2778 = vmatmul.mubr.bf16.vlgmr.msra.gmra.mrb[28].mxu1 %v1425_v37 }
 0x1fc   :  { %v3079_v38 = vpop.f32.mrb[16].mxu0  ;;  %v3101_v39 = vpop.f32.mrb[16].mxu1 }
 0x1fd   :  { %v3080_v41 = vpop.f32.mrb[17].mxu0  ;;  %v3102_v43 = vpop.f32.mrb[17].mxu1 }
 0x1fe   :  { %v3081_v42 = vadd.f32 %v3080_v41, %v3079_v38  ;;  %v3082_v44 = vpop.f32.mrb[18].mxu0  ;;  %v3103_v45 = vadd.f32 %v3102_v43, %v3101_v39  ;;  %v3104_v46 = vpop.f32.mrb[18].mxu1 }
 0x1ff   :  { %v3083_v47 = vpop.f32.mrb[19].mxu0  ;;  %v3105_v0 = vpop.f32.mrb[19].mxu1 }
 0x200   :  { %v2493_v48 = vadd.f32 %v3081_v42, %v2934_v40  ;;  %v3084_v50 = vadd.f32 %v3083_v47, %v3082_v44  ;;  %v3106_v34 = vadd.f32 %v3105_v0, %v3104_v46 }
 0x202   :  { %v2534_v51 = vadd.f32 %v3103_v45, %v2493_v48  ;;  %v2496_v52 = vadd.f32 %v3084_v50, %v2934_v40 }
 0x204   :  { %v2537_v53 = vadd.f32 %v3106_v34, %v2496_v52 }
 0x21c   :  { %v3123_v54 = vpop.f32.mrb[20].mxu0  ;;  %v3145_v55 = vpop.f32.mrb[20].mxu1 }
 0x21d   :  { %v3124_v56 = vpop.f32.mrb[21].mxu0  ;;  %v3146_v59 = vpop.f32.mrb[21].mxu1 }
 0x21e   :  { %v3125_v57 = vadd.f32 %v3124_v56, %v3123_v54  ;;  %v3126_v60 = vpop.f32.mrb[22].mxu0  ;;  %v3147_v61 = vadd.f32 %v3146_v59, %v3145_v55  ;;  %v3148_v62 = vpop.f32.mrb[22].mxu1 }
 0x21f   :  { %v3127_v63 = vpop.f32.mrb[23].mxu0  ;;  %v3149_v3 = vpop.f32.mrb[23].mxu1 }
 0x220   :  { %v2575_v1 = vadd.f32 %v3125_v57, %v2534_v51  ;;  %v3128_v2 = vadd.f32 %v3127_v63, %v3126_v60  ;;  %v3150_v4 = vadd.f32 %v3149_v3, %v3148_v62 }
 0x222   :  { %v2616_v5 = vadd.f32 %v3147_v61, %v2575_v1  ;;  %v2578_v49 = vadd.f32 %v3128_v2, %v2537_v53 }
 0x224   :  { %v2619_v6 = vadd.f32 %v3150_v4, %v2578_v49 }
 0x23c   :  { %v3167_v7 = vpop.f32.mrb[24].mxu0  ;;  %v3189_v8 = vpop.f32.mrb[24].mxu1 }
 0x23d   :  { %v3168_v9 = vpop.f32.mrb[25].mxu0  ;;  %v3190_v11 = vpop.f32.mrb[25].mxu1 }
 0x23e   :  { %v3169_v10 = vadd.f32 %v3168_v9, %v3167_v7  ;;  %v3170_v13 = vpop.f32.mrb[26].mxu0  ;;  %v3191_v14 = vadd.f32 %v3190_v11, %v3189_v8  ;;  %v3192_v15 = vpop.f32.mrb[26].mxu1 }
 0x23f   :  { %v3171_v16 = vpop.f32.mrb[27].mxu0  ;;  %v3193_v19 = vpop.f32.mrb[27].mxu1 }
 0x240   :  { %v2657_v17 = vadd.f32 %v3169_v10, %v2616_v5  ;;  %v3172_v18 = vadd.f32 %v3171_v16, %v3170_v13  ;;  %v3194_v20 = vadd.f32 %v3193_v19, %v3192_v15 }
 0x242   :  { %v2698_v21 = vadd.f32 %v3191_v14, %v2657_v17  ;;  %v2660_v22 = vadd.f32 %v3172_v18, %v2619_v6 }
 0x244   :  { %v2701_v23 = vadd.f32 %v3194_v20, %v2660_v22 }
 0x25c   :  { %v3211_v24 = vpop.f32.mrb[28].mxu0  ;;  %v3233_v25 = vpop.f32.mrb[28].mxu1 }
 0x25d   :  { %v3212_v26 = vpop.f32.mrb[29].mxu0  ;;  %v3234_v12 = vpop.f32.mrb[29].mxu1 }
 0x25e   :  { %v3213_v27 = vadd.f32 %v3212_v26, %v3211_v24  ;;  %v3214_v28 = vpop.f32.mrb[30].mxu0  ;;  %v3235_v29 = vadd.f32 %v3234_v12, %v3233_v25  ;;  %v3236_v30 = vpop.f32.mrb[30].mxu1 }
 0x25f   :  { %v3215_v31 = vpop.f32.mrb[31].mxu0  ;;  %v3237_v35 = vpop.f32.mrb[31].mxu1 }
 0x260   :  { %v2739_v32 = vadd.f32 %v3213_v27, %v2698_v21  ;;  %v3216_v33 = vadd.f32 %v3215_v31, %v3214_v28  ;;  %v3238_v36 = vadd.f32 %v3237_v35, %v3236_v30 }
 0x262   :  { %v2780_v58 = vadd.f32 %v3235_v29, %v2739_v32  ;;  %v2742_v37 = vadd.f32 %v3216_v33, %v2701_v23 }
 0x264   :  { %2786 = vst [vmem:[#allocation7] sm:$0xff] %v2780_v58  ;;  %v2783_v38 = vadd.f32 %v3238_v36, %v2742_v37 }
 0x266   :  { %2787 = vst [vmem:[#allocation7 + $0x8] sm:$0xff] %v2783_v38 }
 0x267   :  { %3434 = shalt.err (!%p3431_p6)
}
 0x268   :  { %s3435_s30 = scalar_lea.hbm %s3618_s5, 256 }
 0x269   :  { %p3436_p7 = scmp.ne.s32.totalorder %s3618_s5, %s3435_s30  ;;  %p3439_p8 = scmp.lt.u32.totalorder %s3435_s30, %s3618_s5 }
 0x26b   :  { %p3441_p9 = pnand %p3439_p8, %p3436_p7 }
 0x26d   :  { %3444 = shalt.err (!%p3441_p9)
}
 0x26e   :  { %s3459_s10 = smov 128   ;;  %s3460_s11 = smov 8  }
 0x26f   :  { %2799 = dma.vmem_to_hbm [thread:$0]  %s2794_s26, 256, %s3618_s5, [#allocation4], %s3459_s10, %s3459_s10, %s3460_s11  }
 0x270   :  { %3449 = dma.done.wait [#allocation4], 256  }
 0x271   :  { %3450 = vsyncadd [#allocation4], 4294967040 }
 0x272   :  { %2803 = vsyncpa [#allocation3], 1 }
 0x273   :  { %2804 = vsyncpa [#allocation6], 1 }
 0x274   :  { %2805 = vsyncpa [#allocation4], 1 }

</bundles_post_ra>
